<compile_context>
chip_gen: v6e
topology: v6e:2x2x1
jax: 0.10.0
libtpu: 0.0.40
codegen_flags: <defaults>
</compile_context>

<pallas_src>
import functools
import math

import jax
import jax.numpy as jnp
from jax.experimental import pallas as pl
from jax.experimental.pallas import tpu as pltpu


# ----------------------------------------------------------------------------- helpers

def _round_up(x, m):
    return ((x + m - 1) // m) * m


def _padded_bytes(shape, dtype):
    """Approximate VMEM footprint of a block, accounting for (8,128) tile padding."""
    s = list(shape)
    if len(s) >= 1:
        s[-1] = _round_up(s[-1], 128)
    if len(s) >= 2:
        s[-2] = _round_up(s[-2], 8)
    return math.prod(s) * jnp.dtype(dtype).itemsize


# ----------------------------------------------------------------------------- linear kernels

def _fused_linear_kernel(*refs, n_pairs):
    # refs = x_0..x_{n-1}, w_0..w_{n-1}, b_0..b_{n-1}, o_0..o_{n-1}
    xs = refs[:n_pairs]
    ws = refs[n_pairs:2 * n_pairs]
    bs = refs[2 * n_pairs:3 * n_pairs]
    outs = refs[3 * n_pairs:]
    for x_ref, w_ref, b_ref, o_ref in zip(xs, ws, bs, outs):
        acc = jnp.dot(x_ref[...].astype(jnp.bfloat16), w_ref[...],      # weights already bf16
                      preferred_element_type=jnp.float32) + b_ref[...]  # bias add in f32
        o_ref[...] = acc.astype(o_ref.dtype)                            # bf16 store (half HBM)


def fused_linear(xs, ws, bs, *, tile_m=1024):
    """Several y_i = x_i @ w_i + b_i in ONE pallas_call; all x_i share the same row count M.

    Weights are cast to bf16 ONCE on the host (resident across M tiles -> no per-step cast),
    activations are emitted in bf16. Tiled over M so BlockSpec double-buffers HBM against MXU.
    """
    lead = xs[0].shape[:-1]
    x2s = [x.reshape(-1, x.shape[-1]) for x in xs]
    M = x2s[0].shape[0]
    for x2 in x2s:
        assert x2.shape[0] == M, "fused_linear inputs must share the row count"
    ws = [w.astype(jnp.bfloat16) for w in ws]          # host-side one-time cast
    bs = [b.astype(jnp.float32).reshape(1, -1) for b in bs]
    tm = min(tile_m, _round_up(M, 8))
    grid = (pl.cdiv(M, tm),)

    in_specs = (
        [pl.BlockSpec((tm, x2.shape[1]), lambda i: (i, 0)) for x2 in x2s]
        + [pl.BlockSpec(w.shape, lambda i: (0, 0)) for w in ws]
        + [pl.BlockSpec((1, b.shape[-1]), lambda i: (0, 0)) for b in bs]
    )
    out_shape = tuple(jax.ShapeDtypeStruct((M, w.shape[1]), jnp.bfloat16) for w in ws)
    out_specs = tuple(pl.BlockSpec((tm, w.shape[1]), lambda i: (i, 0)) for w in ws)

    kernel = functools.partial(_fused_linear_kernel, n_pairs=len(xs))
    outs = pl.pallas_call(
        kernel,
        out_shape=out_shape,
        grid=grid,
        in_specs=in_specs,
        out_specs=out_specs,
        compiler_params=pltpu.CompilerParams(dimension_semantics=("parallel",)),
    )(*x2s, *ws, *bs)
    if not isinstance(outs, (tuple, list)):
        outs = (outs,)
    return [o.reshape(*lead, o.shape[-1]) for o in outs]


def linear(x, w, b):
    return fused_linear([x], [w], [b])[0]


# ----------------------------------------------------------------------------- fused hierarchical attention

def _fused_attn_kernel(qs_ref, qw_ref, qt_ref,
                       ks_ref, vs_ref, pt_ref, biass_ref,
                       kt_ref, vt_ref, biast_ref,
                       kw_ref, vw_ref, biasw_ref,
                       wbig_ref, bbig_ref,
                       out_ref,
                       sattn_ref, ctxs_ref, accw_ref,
                       *, n_heads, d_v):
    """grid = (B, Nb). q* pre-scaled by 1/sqrt(d_k); all q/k/v bf16, biases f32.

    ctxs_ref is the combined-head context slab [Lq, 3*H*dv] = [topic | graph | word] matching the
    torch.cat([context_t, context_s, context_w]) @ fc layout, so the finalize is ONE matmul with
    K = 3*H*dv (folded graph_fc / sent_fc / fc_topic / fc).
    """
    H, dv = n_heads, d_v
    n = pl.program_id(1)
    n_last = pl.num_programs(1) - 1

    @pl.when(n == 0)
    def _():
        # ---------------- topic attention (slice 0 of ctxs) ----------------
        sc = jnp.einsum("hqd,hnd->hqn", qt_ref[0], kt_ref[0],
                        preferred_element_type=jnp.float32) + biast_ref[0]
        m = jnp.max(sc, axis=-1, keepdims=True)
        e = jnp.exp(sc - m)
        p = e * pl.reciprocal(jnp.sum(e, axis=-1, keepdims=True), approx=True)
        ctx_t = jnp.einsum("hqn,hnd->hqd", p.astype(jnp.bfloat16), vt_ref[0],
                           preferred_element_type=jnp.float32)                 # [H, Lq, dv]

        # ------------- graph / sentence attention (slice 1 of ctxs) --------
        kp = ks_ref[0] + pt_ref[0]                 # fused: q@(k+pt)^T == q@k^T + q@pt^T
        sc = jnp.einsum("hqd,hnd->hqn", qs_ref[0], kp,
                        preferred_element_type=jnp.float32) + biass_ref[0]
        m = jnp.max(sc, axis=-1, keepdims=True)
        e = jnp.exp(sc - m)
        p = e / jnp.sum(e, axis=-1, keepdims=True)  # exact: reused as the sentence re-weight
        ctx_s = jnp.einsum("hqn,hnd->hqd", p.astype(jnp.bfloat16), vs_ref[0],
                           preferred_element_type=jnp.float32)                 # [H, Lq, dv]

        # keep sentence-level probs resident in VMEM, one column per word block
        n_blocks = p.shape[-1]
        for j in range(n_blocks):
            sattn_ref[j] = p[:, :, j:j + 1]        # [H, Lq, 1]

        # pack combined-head layout (feature index = h*dv + d, same as unshape())
        for h in range(H):
            ctxs_ref[:, h * dv:(h + 1) * dv] = ctx_t[h]
            ctxs_ref[:, (H + h) * dv:(H + h + 1) * dv] = ctx_s[h]
        accw_ref[...] = jnp.zeros_like(accw_ref)

    # ---------------- word attention for block n, sentence-normed ----------
    sc = jnp.einsum("hqd,htd->hqt", qw_ref[0], kw_ref[0, 0],
                    preferred_element_type=jnp.float32) + biasw_ref[0, 0]
    m = jnp.max(sc, axis=-1, keepdims=True)
    e = jnp.exp(sc - m)
    p = e * pl.reciprocal(jnp.sum(e, axis=-1, keepdims=True), approx=True)
    blk = jnp.einsum("hqt,htd->hqd", p.astype(jnp.bfloat16), vw_ref[0, 0],
                     preferred_element_type=jnp.float32)                       # [H, Lq, dv]
    accw_ref[...] += blk * sattn_ref[n]            # re-weight by graph attn + sum over blocks

    @pl.when(n == n_last)
    def _():
        for h in range(H):
            ctxs_ref[:, (2 * H + h) * dv:(2 * H + h + 1) * dv] = accw_ref[h]
        # single fused output projection: (ctx_topic|ctx_graph|ctx_word) @ W_big + b_big
        out_ref[0] = (jnp.dot(ctxs_ref[...].astype(jnp.bfloat16), wbig_ref[...],
                              preferred_element_type=jnp.float32) + bbig_ref[...])


def fused_hier_attention(q_s, q_w, q_t, k_s, v_s, pt, bias_s,
                         k_t, v_t, bias_t, k_w, v_w, bias_w,
                         w_big, b_big, *, n_heads, d_v):
    B, H, Lq, dk = q_s.shape
    Nb = k_s.shape[2]
    Ntop = k_t.shape[2]
    Nt = k_w.shape[3]
    dv = d_v
    d_model = w_big.shape[1]

    in_specs = [
        pl.BlockSpec((1, H, Lq, dk), lambda b, n: (b, 0, 0, 0)),        # q_s
        pl.BlockSpec((1, H, Lq, dk), lambda b, n: (b, 0, 0, 0)),        # q_w
        pl.BlockSpec((1, H, Lq, dk), lambda b, n: (b, 0, 0, 0)),        # q_t
        pl.BlockSpec((1, H, Nb, dk), lambda b, n: (b, 0, 0, 0)),        # k_s
        pl.BlockSpec((1, H, Nb, dv), lambda b, n: (b, 0, 0, 0)),        # v_s
        pl.BlockSpec((1, H, Nb, dk), lambda b, n: (b, 0, 0, 0)),        # pt
        pl.BlockSpec((1, H, Lq, Nb), lambda b, n: (b, 0, 0, 0)),        # bias_s
        pl.BlockSpec((1, H, Ntop, dk), lambda b, n: (b, 0, 0, 0)),      # k_t
        pl.BlockSpec((1, H, Ntop, dv), lambda b, n: (b, 0, 0, 0)),      # v_t
        pl.BlockSpec((1, H, Lq, Ntop), lambda b, n: (b, 0, 0, 0)),      # bias_t
        pl.BlockSpec((1, 1, H, Nt, dk), lambda b, n: (b, n, 0, 0, 0)),  # k_w
        pl.BlockSpec((1, 1, H, Nt, dv), lambda b, n: (b, n, 0, 0, 0)),  # v_w
        pl.BlockSpec((1, 1, H, Lq, Nt), lambda b, n: (b, n, 0, 0, 0)),  # bias_w
        pl.BlockSpec((3 * H * dv, d_model), lambda b, n: (0, 0)),       # W_big (resident bf16)
        pl.BlockSpec((1, d_model), lambda b, n: (0, 0)),                # b_big (f32)
    ]
    scratch_shapes = [
        pltpu.VMEM((Nb, H, Lq, 1), jnp.float32),       # graph attn probs (per word-block column)
        pltpu.VMEM((Lq, 3 * H * dv), jnp.float32),     # combined-head context [topic|graph|word]
        pltpu.VMEM((H, Lq, dv), jnp.float32),          # word-block accumulator
    ]

    # Derive a v7x-safe (<= 64 MiB) VMEM budget from the actual block sizes (double-buffered
    # inputs/outputs + scratch), with headroom for compiler scratch.
    block_list = (
        [((1, H, Lq, dk), jnp.bfloat16)] * 3
        + [((1, H, Nb, dk), jnp.bfloat16), ((1, H, Nb, dv), jnp.bfloat16),
           ((1, H, Nb, dk), jnp.bfloat16), ((1, H, Lq, Nb), jnp.float32),
           ((1, H, Ntop, dk), jnp.bfloat16), ((1, H, Ntop, dv), jnp.bfloat16),
           ((1, H, Lq, Ntop), jnp.float32),
           ((1, 1, H, Nt, dk), jnp.bfloat16), ((1, 1, H, Nt, dv), jnp.bfloat16),
           ((1, 1, H, Lq, Nt), jnp.float32),
           ((3 * H * dv, d_model), jnp.bfloat16), ((1, d_model), jnp.float32),
           ((1, Lq, d_model), jnp.float32)]
    )
    scratch_list = [((Nb, H, Lq, 1), jnp.float32), ((Lq, 3 * H * dv), jnp.float32),
                    ((H, Lq, dv), jnp.float32)]
    est = (2 * sum(_padded_bytes(s, d) for s, d in block_list)
           + sum(_padded_bytes(s, d) for s, d in scratch_list))
    vmem_limit = int(min(64 << 20, max(24 << 20, 2 * est + (8 << 20))))

    kernel = functools.partial(_fused_attn_kernel, n_heads=H, d_v=dv)
    return pl.pallas_call(
        kernel,
        out_shape=jax.ShapeDtypeStruct((B, Lq, d_model), jnp.float32),
        grid=(B, Nb),                                  # Nb = reduction axis (last, "arbitrary")
        in_specs=in_specs,
        out_specs=pl.BlockSpec((1, Lq, d_model), lambda b, n: (b, 0, 0)),
        scratch_shapes=scratch_shapes,
        compiler_params=pltpu.CompilerParams(
            dimension_semantics=("parallel", "arbitrary"),
            vmem_limit_bytes=vmem_limit,
        ),
    )(q_s, q_w, q_t, k_s, v_s, pt, bias_s, k_t, v_t, bias_t, k_w, v_w, bias_w, w_big, b_big)


# ----------------------------------------------------------------------------- module

def init_params(key, d_model, d_k, d_v, n_heads):
    shapes = {
        "w_qs_s": (d_model, n_heads * d_k),
        "w_ks_s": (d_model, n_heads * d_k),
        "w_vs_s": (d_model, n_heads * d_v),
        "w_qs_w": (d_model, n_heads * d_k),
        "w_ks_w": (d_model, n_heads * d_k),
        "w_vs_w": (d_model, n_heads * d_v),
        "w_qs_t": (d_model, n_heads * d_k),
        "w_ks_t": (d_model, n_heads * d_k),
        "w_vs_t": (d_model, n_heads * d_v),
        "fc_pt": (d_model, n_heads * d_k),
        "fc_topic": (d_model, d_model),
        "fc": (3 * d_model, d_model),
        "graph_fc": (n_heads * d_v, d_model),   # output proj inside graph_attn
        "sent_fc": (n_heads * d_v, d_model),    # output proj inside attn_with_sent_norm
    }
    params = {}
    for i, (name, (fi, fo)) in enumerate(sorted(shapes.items())):
        kw, kb = jax.random.split(jax.random.fold_in(key, i))
        params[name] = (
            0.05 * jax.random.normal(kw, (fi, fo), jnp.float32),
            0.05 * jax.random.normal(kb, (fo,), jnp.float32),
        )
    return params


def multi_head_hierarchical_attention(
    params, q, k_s, v_s, k_w, v_w, bias_w, bias_s, graph_attn_bias,
    topic, topic_attn_bias, pt_attn, *, n_heads, d_k, d_v,
):
    del graph_attn_bias  # TODO(synk): received but never used in the reference forward()
    B, Lq, d_model = q.shape
    Nb = k_s.shape[1]
    H = n_heads
    scale = 1.0 / (d_k ** 0.5)

    def shape4(x):                               # [B, L, H*dk] -> [B, H, L, dk]
        return x.reshape(B, -1, H, d_k).transpose(0, 2, 1, 3)

    def shape_w(x):                              # [B, Nb, Nt, H*dk] -> [B, Nb, H, Nt, dk]
        return x.reshape(B, Nb, -1, H, d_k).transpose(0, 1, 3, 2, 4)

    # ---- one GEMM for all three q projections (shared input q); fold 1/sqrt(d_k) into weights
    wq = jnp.concatenate([params["w_qs_s"][0], params["w_qs_w"][0], params["w_qs_t"][0]],
                         axis=1) * scale
    bq = jnp.concatenate([params["w_qs_s"][1], params["w_qs_w"][1], params["w_qs_t"][1]],
                         axis=0) * scale
    q_all = linear(q, wq, bq)                    # bf16 [B, Lq, 3*H*dk]
    q_s = shape4(q_all[..., : H * d_k])
    q_w = shape4(q_all[..., H * d_k: 2 * H * d_k])
    q_t = shape4(q_all[..., 2 * H * d_k:])

    # ---- sentence-level K/V + paragraph-topic projection in one pallas_call (shared M = B*Nb)
    ks_p, vs_p, pt_p = fused_linear(
        [k_s, v_s, pt_attn],
        [params["w_ks_s"][0], params["w_vs_s"][0], params["fc_pt"][0]],
        [params["w_ks_s"][1], params["w_vs_s"][1], params["fc_pt"][1]],
    )
    k_sp, v_sp, pt = shape4(ks_p), shape4(vs_p), shape4(pt_p)

    # ---- word-level K/V in one pallas_call (shared M = B*Nb*Nt)
    kw_p, vw_p = fused_linear(
        [k_w, v_w],
        [params["w_ks_w"][0], params["w_vs_w"][0]],
        [params["w_ks_w"][1], params["w_vs_w"][1]],
    )
    k_wp, v_wp = shape_w(kw_p), shape_w(vw_p)

    # ---- one GEMM for topic K|V (shared input topic)
    wt = jnp.concatenate([params["w_ks_t"][0], params["w_vs_t"][0]], axis=1)
    bt = jnp.concatenate([params["w_ks_t"][1], params["w_vs_t"][1]], axis=0)
    kv_t = linear(topic, wt, bt)
    k_t = shape4(kv_t[..., : H * d_k])
    v_t = shape4(kv_t[..., H * d_k:])

    # ---- fold fc_topic / graph_fc / sent_fc AND the final fc into one combined projection
    #      (the whole chain is linear since dropout = 0):
    #      out = [ctx_t|ctx_s|ctx_w] @ [W_topic@fc_t ; W_graph@fc_s ; W_sent@fc_w] + b_big
    fc_wgt, fc_b = params["fc"]
    fct = fc_wgt[:d_model]
    fcs = fc_wgt[d_model:2 * d_model]
    fcw = fc_wgt[2 * d_model:]
    w_big = jnp.concatenate([params["fc_topic"][0] @ fct,
                             params["graph_fc"][0] @ fcs,
                             params["sent_fc"][0] @ fcw], axis=0).astype(jnp.bfloat16)
    b_big = (fc_b
             + params["fc_topic"][1] @ fct
             + params["graph_fc"][1] @ fcs
             + params["sent_fc"][1] @ fcw).reshape(1, d_model).astype(jnp.float32)

    # ---- fused graph + word(+sentence-norm) + topic attention, one pallas_call
    return fused_hier_attention(q_s, q_w, q_t, k_sp, v_sp, pt, bias_s,
                                k_t, v_t, topic_attn_bias,
                                k_wp, v_wp, bias_w, w_big, b_big,
                                n_heads=H, d_v=d_v)


# ----------------------------------------------------------------------------- pure-JAX reference

def _reference(params, q, k_s, v_s, k_w, v_w, bias_w, bias_s, topic, topic_attn_bias, pt_attn,
               n_heads, d_k, d_v):
    B, Lq, d_model = q.shape
    Nb = k_s.shape[1]
    scale = 1.0 / (d_k ** 0.5)

    def lin(x, w, b):
        return x @ w + b

    def shape4(x):
        return x.reshape(B, -1, n_heads, d_k).transpose(0, 2, 1, 3)

    def shape_w(x):
        return x.reshape(B, Nb, -1, n_heads, d_k).transpose(0, 1, 3, 2, 4)

    def unshape(x):
        return x.transpose(0, 2, 1, 3).reshape(B, -1, n_heads * d_k)

    def softmax(s):
        m = s.max(-1, keepdims=True)
        e = jnp.exp(s - m)
        return e / e.sum(-1, keepdims=True)

    pt = shape4(lin(pt_attn, *params["fc_pt"]))
    q_s = shape4(lin(q, *params["w_qs_s"]))
    k_sp = shape4(lin(k_s, *params["w_ks_s"]))
    v_sp = shape4(lin(v_s, *params["w_vs_s"]))
    sc = (jnp.einsum("bhqd,bhnd->bhqn", q_s * scale, k_sp)
          + jnp.einsum("bhqd,bhnd->bhqn", q_s * scale, pt) + bias_s)
    attn_s = softmax(sc)
    ctx_s = jnp.einsum("bhqn,bhnd->bhqd", attn_s, v_sp)
    context_s = lin(unshape(ctx_s), *params["graph_fc"])

    q_w = shape4(lin(q, *params["w_qs_w"]))
    k_wp = shape_w(lin(k_w, *params["w_ks_w"]))
    v_wp = shape_w(lin(v_w, *params["w_vs_w"]))
    sc_w = jnp.einsum("bhqd,bnhtd->bnhqt", q_w * scale, k_wp) + bias_w
    p_w = softmax(sc_w)
    out_w = jnp.einsum("bnhqt,bnhtd->bnhqd", p_w, v_wp)
    out_w = (out_w * attn_s.transpose(0, 3, 1, 2)[..., None]).sum(axis=1)
    context_w = lin(unshape(out_w), *params["sent_fc"])

    q_t = shape4(lin(q, *params["w_qs_t"]))
    k_t = shape4(lin(topic, *params["w_ks_t"]))
    v_t = shape4(lin(topic, *params["w_vs_t"]))
    sc_t = jnp.einsum("bhqd,bhnd->bhqn", q_t * scale, k_t) + topic_attn_bias
    ctx_t = jnp.einsum("bhqn,bhnd->bhqd", softmax(sc_t), v_t)
    context_t = lin(unshape(ctx_t), *params["fc_topic"])

    out = jnp.concatenate([context_t, context_s, context_w], axis=2)
    return lin(out, *params["fc"])


# ----------------------------------------------------------------------------- demo

if __name__ == "__main__":
    B, Lq, Nb, Nt, n_topics = 2, 8, 4, 8, 4
    n_heads, d_k, d_v = 2, 16, 16
    d_model = n_heads * d_k                      # 32

    key = jax.random.PRNGKey(0)
    ks = jax.random.split(key, 16)

    q = jax.random.normal(ks[0], (B, Lq, d_model), jnp.float32)
    k_s = jax.random.normal(ks[1], (B, Nb, d_model), jnp.float32)
    v_s = jax.random.normal(ks[2], (B, Nb, d_model), jnp.float32)
    k_w = jax.random.normal(ks[3], (B, Nb, Nt, d_model), jnp.float32)
    v_w = jax.random.normal(ks[4], (B, Nb, Nt, d_model), jnp.float32)
    bias_w = 0.01 * jax.random.normal(ks[5], (B, Nb, n_heads, Lq, Nt), jnp.float32)
    bias_s = 0.01 * jax.random.normal(ks[6], (B, n_heads, Lq, Nb), jnp.float32)
    graph_attn_bias = 0.01 * jax.random.normal(ks[7], (B, n_heads, Nb, Nb), jnp.float32)
    topic = jax.random.normal(ks[8], (B, n_topics, d_model), jnp.float32)
    topic_attn_bias = 0.01 * jax.random.normal(ks[9], (B, n_heads, Lq, n_topics), jnp.float32)
    pt_attn = jax.random.normal(ks[10], (B, Nb, d_model), jnp.float32)

    params = init_params(ks[11], d_model, d_k, d_v, n_heads)

    fwd = jax.jit(functools.partial(multi_head_hierarchical_attention,
                                    n_heads=n_heads, d_k=d_k, d_v=d_v))
    out = fwd(params, q, k_s, v_s, k_w, v_w, bias_w, bias_s, graph_attn_bias,
              topic, topic_attn_bias, pt_attn)
    out = jax.block_until_ready(out)
    assert out.shape == (B, Lq, d_model), out.shape
    assert bool(jnp.all(jnp.isfinite(out)))

    ref = _reference(params, q, k_s, v_s, k_w, v_w, bias_w, bias_s,
                     topic, topic_attn_bias, pt_attn, n_heads, d_k, d_v)
    max_err = float(jnp.max(jnp.abs(out - ref)))
    # bf16 MXU operands + approx reciprocal (word/topic softmax) -> small delta vs f32 reference
    assert max_err < 5e-2, f"max abs err {max_err}"
    print("KERNEL_OK")
</pallas_src>

<mosaic_0001>
module attributes {stable_mosaic.version = 11 : i64} {
  func.func @_fused_linear_kernel(%arg0: i32, %arg1: memref<16x32xf32, #tpu.memory_space<vmem>>, %arg2: memref<32x96xbf16, #tpu.memory_space<vmem>>, %arg3: memref<1x96xf32, #tpu.memory_space<vmem>>, %arg4: memref<16x96xbf16, #tpu.memory_space<vmem>>) attributes {dimension_semantics = [#tpu.dimension_semantics<parallel>], iteration_bounds = array<i64: 1>, scalar_prefetch = 0 : i64, scratch_operands = 0 : i64, tpu.core_type = #tpu.core_type<tc>, window_params = [{transform_indices = @transform_0, window_bounds = array<i64: 16, 32>}, {pipeline_mode = #tpu.pipeline_mode<synchronous>, transform_indices = @transform_1, window_bounds = array<i64: 32, 96>}, {pipeline_mode = #tpu.pipeline_mode<synchronous>, transform_indices = @transform_2, window_bounds = array<i64: 1, 96>}, {transform_indices = @transform_3, window_bounds = array<i64: 16, 96>}]} {
    %c0 = arith.constant 0 : index
    %c0_0 = arith.constant 0 : index
    %0 = vector.load %arg1[%c0, %c0_0] : memref<16x32xf32, #tpu.memory_space<vmem>>, vector<16x32xf32>
    %1 = arith.truncf %0 : vector<16x32xf32> to vector<16x32xbf16>
    %c0_1 = arith.constant 0 : index
    %c0_2 = arith.constant 0 : index
    %2 = vector.load %arg2[%c0_1, %c0_2] : memref<32x96xbf16, #tpu.memory_space<vmem>>, vector<32x96xbf16>
    %cst = arith.constant dense<0.000000e+00> : vector<16x96xf32>
    %3 = tpu.matmul %1, %2, %cst {dimension_numbers = #tpu.dot_dimension_numbers<[1], [0], [0], [1], [0, 0, 1, 1], [], []>} : vector<16x32xbf16>, vector<32x96xbf16>, vector<16x96xf32> -> vector<16x96xf32>
    %c0_3 = arith.constant 0 : index
    %c0_4 = arith.constant 0 : index
    %4 = vector.load %arg3[%c0_3, %c0_4] : memref<1x96xf32, #tpu.memory_space<vmem>>, vector<1x96xf32>
    %5 = vector.broadcast %4 : vector<1x96xf32> to vector<16x96xf32>
    %6 = arith.addf %3, %5 : vector<16x96xf32>
    %7 = arith.truncf %6 : vector<16x96xf32> to vector<16x96xbf16>
    %c0_5 = arith.constant 0 : index
    %c0_6 = arith.constant 0 : index
    %8 = vector.load %arg4[%c0_5, %c0_6] : memref<16x96xbf16, #tpu.memory_space<vmem>>, vector<16x96xbf16>
    tpu.vector_store %arg4[%c0_5, %c0_6], %7 {strides = array<i32>} : memref<16x96xbf16, #tpu.memory_space<vmem>>, vector<16x96xbf16>,
    return
  }
  func.func @transform_0(%arg0: i32) -> (i32, i32) {
    %c0_i32 = arith.constant 0 : i32
    %c0_i32_0 = arith.constant 0 : i32
    return %arg0, %c0_i32 : i32, i32
  }
  func.func @transform_1(%arg0: i32) -> (i32, i32) {
    %c0_i32 = arith.constant 0 : i32
    %c0_i32_0 = arith.constant 0 : i32
    %c0_i32_1 = arith.constant 0 : i32
    return %c0_i32, %c0_i32_0 : i32, i32
  }
  func.func @transform_2(%arg0: i32) -> (i32, i32) {
    %c0_i32 = arith.constant 0 : i32
    %c0_i32_0 = arith.constant 0 : i32
    %c0_i32_1 = arith.constant 0 : i32
    return %c0_i32, %c0_i32_0 : i32, i32
  }
  func.func @transform_3(%arg0: i32) -> (i32, i32) {
    %c0_i32 = arith.constant 0 : i32
    %c0_i32_0 = arith.constant 0 : i32
    return %arg0, %c0_i32 : i32, i32
  }
}

module attributes {stable_mosaic.version = 11 : i64} {
  func.func @_fused_linear_kernel(%arg0: i32, %arg1: memref<8x32xf32, #tpu.memory_space<vmem>>, %arg2: memref<8x32xf32, #tpu.memory_space<vmem>>, %arg3: memref<8x32xf32, #tpu.memory_space<vmem>>, %arg4: memref<32x32xbf16, #tpu.memory_space<vmem>>, %arg5: memref<32x32xbf16, #tpu.memory_space<vmem>>, %arg6: memref<32x32xbf16, #tpu.memory_space<vmem>>, %arg7: memref<1x32xf32, #tpu.memory_space<vmem>>, %arg8: memref<1x32xf32, #tpu.memory_space<vmem>>, %arg9: memref<1x32xf32, #tpu.memory_space<vmem>>, %arg10: memref<8x32xbf16, #tpu.memory_space<vmem>>, %arg11: memref<8x32xbf16, #tpu.memory_space<vmem>>, %arg12: memref<8x32xbf16, #tpu.memory_space<vmem>>) attributes {dimension_semantics = [#tpu.dimension_semantics<parallel>], iteration_bounds = array<i64: 1>, scalar_prefetch = 0 : i64, scratch_operands = 0 : i64, tpu.core_type = #tpu.core_type<tc>, window_params = [{transform_indices = @transform_0, window_bounds = array<i64: 8, 32>}, {transform_indices = @transform_1, window_bounds = array<i64: 8, 32>}, {transform_indices = @transform_2, window_bounds = array<i64: 8, 32>}, {pipeline_mode = #tpu.pipeline_mode<synchronous>, transform_indices = @transform_3, window_bounds = array<i64: 32, 32>}, {pipeline_mode = #tpu.pipeline_mode<synchronous>, transform_indices = @transform_4, window_bounds = array<i64: 32, 32>}, {pipeline_mode = #tpu.pipeline_mode<synchronous>, transform_indices = @transform_5, window_bounds = array<i64: 32, 32>}, {pipeline_mode = #tpu.pipeline_mode<synchronous>, transform_indices = @transform_6, window_bounds = array<i64: 1, 32>}, {pipeline_mode = #tpu.pipeline_mode<synchronous>, transform_indices = @transform_7, window_bounds = array<i64: 1, 32>}, {pipeline_mode = #tpu.pipeline_mode<synchronous>, transform_indices = @transform_8, window_bounds = array<i64: 1, 32>}, {transform_indices = @transform_9, window_bounds = array<i64: 8, 32>}, {transform_indices = @transform_10, window_bounds = array<i64: 8, 32>}, {transform_indices = @transform_11, window_bounds = array<i64: 8, 32>}]} {
    %c0 = arith.constant 0 : index
    %c0_0 = arith.constant 0 : index
    %0 = vector.load %arg1[%c0, %c0_0] : memref<8x32xf32, #tpu.memory_space<vmem>>, vector<8x32xf32>
    %1 = arith.truncf %0 : vector<8x32xf32> to vector<8x32xbf16>
    %c0_1 = arith.constant 0 : index
    %c0_2 = arith.constant 0 : index
    %2 = vector.load %arg4[%c0_1, %c0_2] : memref<32x32xbf16, #tpu.memory_space<vmem>>, vector<32x32xbf16>
    %cst = arith.constant dense<0.000000e+00> : vector<8x32xf32>
    %3 = tpu.matmul %1, %2, %cst {dimension_numbers = #tpu.dot_dimension_numbers<[1], [0], [0], [1], [0, 0, 1, 1], [], []>} : vector<8x32xbf16>, vector<32x32xbf16>, vector<8x32xf32> -> vector<8x32xf32>
    %c0_3 = arith.constant 0 : index
    %c0_4 = arith.constant 0 : index
    %4 = vector.load %arg7[%c0_3, %c0_4] : memref<1x32xf32, #tpu.memory_space<vmem>>, vector<1x32xf32>
    %5 = vector.broadcast %4 : vector<1x32xf32> to vector<8x32xf32>
    %6 = arith.addf %3, %5 : vector<8x32xf32>
    %7 = arith.truncf %6 : vector<8x32xf32> to vector<8x32xbf16>
    %c0_5 = arith.constant 0 : index
    %c0_6 = arith.constant 0 : index
    %8 = vector.load %arg10[%c0_5, %c0_6] : memref<8x32xbf16, #tpu.memory_space<vmem>>, vector<8x32xbf16>
    tpu.vector_store %arg10[%c0_5, %c0_6], %7 {strides = array<i32>} : memref<8x32xbf16, #tpu.memory_space<vmem>>, vector<8x32xbf16>,
    %c0_7 = arith.constant 0 : index
    %c0_8 = arith.constant 0 : index
    %9 = vector.load %arg2[%c0_7, %c0_8] : memref<8x32xf32, #tpu.memory_space<vmem>>, vector<8x32xf32>
    %10 = arith.truncf %9 : vector<8x32xf32> to vector<8x32xbf16>
    %c0_9 = arith.constant 0 : index
    %c0_10 = arith.constant 0 : index
    %11 = vector.load %arg5[%c0_9, %c0_10] : memref<32x32xbf16, #tpu.memory_space<vmem>>, vector<32x32xbf16>
    %cst_11 = arith.constant dense<0.000000e+00> : vector<8x32xf32>
    %12 = tpu.matmul %10, %11, %cst_11 {dimension_numbers = #tpu.dot_dimension_numbers<[1], [0], [0], [1], [0, 0, 1, 1], [], []>} : vector<8x32xbf16>, vector<32x32xbf16>, vector<8x32xf32> -> vector<8x32xf32>
    %c0_12 = arith.constant 0 : index
    %c0_13 = arith.constant 0 : index
    %13 = vector.load %arg8[%c0_12, %c0_13] : memref<1x32xf32, #tpu.memory_space<vmem>>, vector<1x32xf32>
    %14 = vector.broadcast %13 : vector<1x32xf32> to vector<8x32xf32>
    %15 = arith.addf %12, %14 : vector<8x32xf32>
    %16 = arith.truncf %15 : vector<8x32xf32> to vector<8x32xbf16>
    %c0_14 = arith.constant 0 : index
    %c0_15 = arith.constant 0 : index
    %17 = vector.load %arg11[%c0_14, %c0_15] : memref<8x32xbf16, #tpu.memory_space<vmem>>, vector<8x32xbf16>
    tpu.vector_store %arg11[%c0_14, %c0_15], %16 {strides = array<i32>} : memref<8x32xbf16, #tpu.memory_space<vmem>>, vector<8x32xbf16>,
    %c0_16 = arith.constant 0 : index
    %c0_17 = arith.constant 0 : index
    %18 = vector.load %arg3[%c0_16, %c0_17] : memref<8x32xf32, #tpu.memory_space<vmem>>, vector<8x32xf32>
    %19 = arith.truncf %18 : vector<8x32xf32> to vector<8x32xbf16>
    %c0_18 = arith.constant 0 : index
    %c0_19 = arith.constant 0 : index
    %20 = vector.load %arg6[%c0_18, %c0_19] : memref<32x32xbf16, #tpu.memory_space<vmem>>, vector<32x32xbf16>
    %cst_20 = arith.constant dense<0.000000e+00> : vector<8x32xf32>
    %21 = tpu.matmul %19, %20, %cst_20 {dimension_numbers = #tpu.dot_dimension_numbers<[1], [0], [0], [1], [0, 0, 1, 1], [], []>} : vector<8x32xbf16>, vector<32x32xbf16>, vector<8x32xf32> -> vector<8x32xf32>
    %c0_21 = arith.constant 0 : index
    %c0_22 = arith.constant 0 : index
    %22 = vector.load %arg9[%c0_21, %c0_22] : memref<1x32xf32, #tpu.memory_space<vmem>>, vector<1x32xf32>
    %23 = vector.broadcast %22 : vector<1x32xf32> to vector<8x32xf32>
    %24 = arith.addf %21, %23 : vector<8x32xf32>
    %25 = arith.truncf %24 : vector<8x32xf32> to vector<8x32xbf16>
    %c0_23 = arith.constant 0 : index
    %c0_24 = arith.constant 0 : index
    %26 = vector.load %arg12[%c0_23, %c0_24] : memref<8x32xbf16, #tpu.memory_space<vmem>>, vector<8x32xbf16>
    tpu.vector_store %arg12[%c0_23, %c0_24], %25 {strides = array<i32>} : memref<8x32xbf16, #tpu.memory_space<vmem>>, vector<8x32xbf16>,
    return
  }
  func.func @transform_0(%arg0: i32) -> (i32, i32) {
    %c0_i32 = arith.constant 0 : i32
    %c0_i32_0 = arith.constant 0 : i32
    return %arg0, %c0_i32 : i32, i32
  }
  func.func @transform_1(%arg0: i32) -> (i32, i32) {
    %c0_i32 = arith.constant 0 : i32
    %c0_i32_0 = arith.constant 0 : i32
    return %arg0, %c0_i32 : i32, i32
  }
  func.func @transform_2(%arg0: i32) -> (i32, i32) {
    %c0_i32 = arith.constant 0 : i32
    %c0_i32_0 = arith.constant 0 : i32
    return %arg0, %c0_i32 : i32, i32
  }
  func.func @transform_3(%arg0: i32) -> (i32, i32) {
    %c0_i32 = arith.constant 0 : i32
    %c0_i32_0 = arith.constant 0 : i32
    %c0_i32_1 = arith.constant 0 : i32
    return %c0_i32, %c0_i32_0 : i32, i32
  }
  func.func @transform_4(%arg0: i32) -> (i32, i32) {
    %c0_i32 = arith.constant 0 : i32
    %c0_i32_0 = arith.constant 0 : i32
    %c0_i32_1 = arith.constant 0 : i32
    return %c0_i32, %c0_i32_0 : i32, i32
  }
  func.func @transform_5(%arg0: i32) -> (i32, i32) {
    %c0_i32 = arith.constant 0 : i32
    %c0_i32_0 = arith.constant 0 : i32
    %c0_i32_1 = arith.constant 0 : i32
    return %c0_i32, %c0_i32_0 : i32, i32
  }
  func.func @transform_6(%arg0: i32) -> (i32, i32) {
    %c0_i32 = arith.constant 0 : i32
    %c0_i32_0 = arith.constant 0 : i32
    %c0_i32_1 = arith.constant 0 : i32
    return %c0_i32, %c0_i32_0 : i32, i32
  }
  func.func @transform_7(%arg0: i32) -> (i32, i32) {
    %c0_i32 = arith.constant 0 : i32
    %c0_i32_0 = arith.constant 0 : i32
    %c0_i32_1 = arith.constant 0 : i32
    return %c0_i32, %c0_i32_0 : i32, i32
  }
  func.func @transform_8(%arg0: i32) -> (i32, i32) {
    %c0_i32 = arith.constant 0 : i32
    %c0_i32_0 = arith.constant 0 : i32
    %c0_i32_1 = arith.constant 0 : i32
    return %c0_i32, %c0_i32_0 : i32, i32
  }
  func.func @transform_9(%arg0: i32) -> (i32, i32) {
    %c0_i32 = arith.constant 0 : i32
    %c0_i32_0 = arith.constant 0 : i32
    return %arg0, %c0_i32 : i32, i32
  }
  func.func @transform_10(%arg0: i32) -> (i32, i32) {
    %c0_i32 = arith.constant 0 : i32
    %c0_i32_0 = arith.constant 0 : i32
    return %arg0, %c0_i32 : i32, i32
  }
  func.func @transform_11(%arg0: i32) -> (i32, i32) {
    %c0_i32 = arith.constant 0 : i32
    %c0_i32_0 = arith.constant 0 : i32
    return %arg0, %c0_i32 : i32, i32
  }
}

module attributes {stable_mosaic.version = 11 : i64} {
  func.func @_fused_linear_kernel(%arg0: i32, %arg1: memref<64x32xf32, #tpu.memory_space<vmem>>, %arg2: memref<64x32xf32, #tpu.memory_space<vmem>>, %arg3: memref<32x32xbf16, #tpu.memory_space<vmem>>, %arg4: memref<32x32xbf16, #tpu.memory_space<vmem>>, %arg5: memref<1x32xf32, #tpu.memory_space<vmem>>, %arg6: memref<1x32xf32, #tpu.memory_space<vmem>>, %arg7: memref<64x32xbf16, #tpu.memory_space<vmem>>, %arg8: memref<64x32xbf16, #tpu.memory_space<vmem>>) attributes {dimension_semantics = [#tpu.dimension_semantics<parallel>], iteration_bounds = array<i64: 1>, scalar_prefetch = 0 : i64, scratch_operands = 0 : i64, tpu.core_type = #tpu.core_type<tc>, window_params = [{transform_indices = @transform_0, window_bounds = array<i64: 64, 32>}, {transform_indices = @transform_1, window_bounds = array<i64: 64, 32>}, {pipeline_mode = #tpu.pipeline_mode<synchronous>, transform_indices = @transform_2, window_bounds = array<i64: 32, 32>}, {pipeline_mode = #tpu.pipeline_mode<synchronous>, transform_indices = @transform_3, window_bounds = array<i64: 32, 32>}, {pipeline_mode = #tpu.pipeline_mode<synchronous>, transform_indices = @transform_4, window_bounds = array<i64: 1, 32>}, {pipeline_mode = #tpu.pipeline_mode<synchronous>, transform_indices = @transform_5, window_bounds = array<i64: 1, 32>}, {transform_indices = @transform_6, window_bounds = array<i64: 64, 32>}, {transform_indices = @transform_7, window_bounds = array<i64: 64, 32>}]} {
    %c0 = arith.constant 0 : index
    %c0_0 = arith.constant 0 : index
    %0 = vector.load %arg1[%c0, %c0_0] : memref<64x32xf32, #tpu.memory_space<vmem>>, vector<64x32xf32>
    %1 = arith.truncf %0 : vector<64x32xf32> to vector<64x32xbf16>
    %c0_1 = arith.constant 0 : index
    %c0_2 = arith.constant 0 : index
    %2 = vector.load %arg3[%c0_1, %c0_2] : memref<32x32xbf16, #tpu.memory_space<vmem>>, vector<32x32xbf16>
    %cst = arith.constant dense<0.000000e+00> : vector<64x32xf32>
    %3 = tpu.matmul %1, %2, %cst {dimension_numbers = #tpu.dot_dimension_numbers<[1], [0], [0], [1], [0, 0, 1, 1], [], []>} : vector<64x32xbf16>, vector<32x32xbf16>, vector<64x32xf32> -> vector<64x32xf32>
    %c0_3 = arith.constant 0 : index
    %c0_4 = arith.constant 0 : index
    %4 = vector.load %arg5[%c0_3, %c0_4] : memref<1x32xf32, #tpu.memory_space<vmem>>, vector<1x32xf32>
    %5 = vector.broadcast %4 : vector<1x32xf32> to vector<64x32xf32>
    %6 = arith.addf %3, %5 : vector<64x32xf32>
    %7 = arith.truncf %6 : vector<64x32xf32> to vector<64x32xbf16>
    %c0_5 = arith.constant 0 : index
    %c0_6 = arith.constant 0 : index
    %8 = vector.load %arg7[%c0_5, %c0_6] : memref<64x32xbf16, #tpu.memory_space<vmem>>, vector<64x32xbf16>
    tpu.vector_store %arg7[%c0_5, %c0_6], %7 {strides = array<i32>} : memref<64x32xbf16, #tpu.memory_space<vmem>>, vector<64x32xbf16>,
    %c0_7 = arith.constant 0 : index
    %c0_8 = arith.constant 0 : index
    %9 = vector.load %arg2[%c0_7, %c0_8] : memref<64x32xf32, #tpu.memory_space<vmem>>, vector<64x32xf32>
    %10 = arith.truncf %9 : vector<64x32xf32> to vector<64x32xbf16>
    %c0_9 = arith.constant 0 : index
    %c0_10 = arith.constant 0 : index
    %11 = vector.load %arg4[%c0_9, %c0_10] : memref<32x32xbf16, #tpu.memory_space<vmem>>, vector<32x32xbf16>
    %cst_11 = arith.constant dense<0.000000e+00> : vector<64x32xf32>
    %12 = tpu.matmul %10, %11, %cst_11 {dimension_numbers = #tpu.dot_dimension_numbers<[1], [0], [0], [1], [0, 0, 1, 1], [], []>} : vector<64x32xbf16>, vector<32x32xbf16>, vector<64x32xf32> -> vector<64x32xf32>
    %c0_12 = arith.constant 0 : index
    %c0_13 = arith.constant 0 : index
    %13 = vector.load %arg6[%c0_12, %c0_13] : memref<1x32xf32, #tpu.memory_space<vmem>>, vector<1x32xf32>
    %14 = vector.broadcast %13 : vector<1x32xf32> to vector<64x32xf32>
    %15 = arith.addf %12, %14 : vector<64x32xf32>
    %16 = arith.truncf %15 : vector<64x32xf32> to vector<64x32xbf16>
    %c0_14 = arith.constant 0 : index
    %c0_15 = arith.constant 0 : index
    %17 = vector.load %arg8[%c0_14, %c0_15] : memref<64x32xbf16, #tpu.memory_space<vmem>>, vector<64x32xbf16>
    tpu.vector_store %arg8[%c0_14, %c0_15], %16 {strides = array<i32>} : memref<64x32xbf16, #tpu.memory_space<vmem>>, vector<64x32xbf16>,
    return
  }
  func.func @transform_0(%arg0: i32) -> (i32, i32) {
    %c0_i32 = arith.constant 0 : i32
    %c0_i32_0 = arith.constant 0 : i32
    return %arg0, %c0_i32 : i32, i32
  }
  func.func @transform_1(%arg0: i32) -> (i32, i32) {
    %c0_i32 = arith.constant 0 : i32
    %c0_i32_0 = arith.constant 0 : i32
    return %arg0, %c0_i32 : i32, i32
  }
  func.func @transform_2(%arg0: i32) -> (i32, i32) {
    %c0_i32 = arith.constant 0 : i32
    %c0_i32_0 = arith.constant 0 : i32
    %c0_i32_1 = arith.constant 0 : i32
    return %c0_i32, %c0_i32_0 : i32, i32
  }
  func.func @transform_3(%arg0: i32) -> (i32, i32) {
    %c0_i32 = arith.constant 0 : i32
    %c0_i32_0 = arith.constant 0 : i32
    %c0_i32_1 = arith.constant 0 : i32
    return %c0_i32, %c0_i32_0 : i32, i32
  }
  func.func @transform_4(%arg0: i32) -> (i32, i32) {
    %c0_i32 = arith.constant 0 : i32
    %c0_i32_0 = arith.constant 0 : i32
    %c0_i32_1 = arith.constant 0 : i32
    return %c0_i32, %c0_i32_0 : i32, i32
  }
  func.func @transform_5(%arg0: i32) -> (i32, i32) {
    %c0_i32 = arith.constant 0 : i32
    %c0_i32_0 = arith.constant 0 : i32
    %c0_i32_1 = arith.constant 0 : i32
    return %c0_i32, %c0_i32_0 : i32, i32
  }
  func.func @transform_6(%arg0: i32) -> (i32, i32) {
    %c0_i32 = arith.constant 0 : i32
    %c0_i32_0 = arith.constant 0 : i32
    return %arg0, %c0_i32 : i32, i32
  }
  func.func @transform_7(%arg0: i32) -> (i32, i32) {
    %c0_i32 = arith.constant 0 : i32
    %c0_i32_0 = arith.constant 0 : i32
    return %arg0, %c0_i32 : i32, i32
  }
}

module attributes {stable_mosaic.version = 11 : i64} {
  func.func @_fused_linear_kernel(%arg0: i32, %arg1: memref<8x32xf32, #tpu.memory_space<vmem>>, %arg2: memref<32x64xbf16, #tpu.memory_space<vmem>>, %arg3: memref<1x64xf32, #tpu.memory_space<vmem>>, %arg4: memref<8x64xbf16, #tpu.memory_space<vmem>>) attributes {dimension_semantics = [#tpu.dimension_semantics<parallel>], iteration_bounds = array<i64: 1>, scalar_prefetch = 0 : i64, scratch_operands = 0 : i64, tpu.core_type = #tpu.core_type<tc>, window_params = [{transform_indices = @transform_0, window_bounds = array<i64: 8, 32>}, {pipeline_mode = #tpu.pipeline_mode<synchronous>, transform_indices = @transform_1, window_bounds = array<i64: 32, 64>}, {pipeline_mode = #tpu.pipeline_mode<synchronous>, transform_indices = @transform_2, window_bounds = array<i64: 1, 64>}, {transform_indices = @transform_3, window_bounds = array<i64: 8, 64>}]} {
    %c0 = arith.constant 0 : index
    %c0_0 = arith.constant 0 : index
    %0 = vector.load %arg1[%c0, %c0_0] : memref<8x32xf32, #tpu.memory_space<vmem>>, vector<8x32xf32>
    %1 = arith.truncf %0 : vector<8x32xf32> to vector<8x32xbf16>
    %c0_1 = arith.constant 0 : index
    %c0_2 = arith.constant 0 : index
    %2 = vector.load %arg2[%c0_1, %c0_2] : memref<32x64xbf16, #tpu.memory_space<vmem>>, vector<32x64xbf16>
    %cst = arith.constant dense<0.000000e+00> : vector<8x64xf32>
    %3 = tpu.matmul %1, %2, %cst {dimension_numbers = #tpu.dot_dimension_numbers<[1], [0], [0], [1], [0, 0, 1, 1], [], []>} : vector<8x32xbf16>, vector<32x64xbf16>, vector<8x64xf32> -> vector<8x64xf32>
    %c0_3 = arith.constant 0 : index
    %c0_4 = arith.constant 0 : index
    %4 = vector.load %arg3[%c0_3, %c0_4] : memref<1x64xf32, #tpu.memory_space<vmem>>, vector<1x64xf32>
    %5 = vector.broadcast %4 : vector<1x64xf32> to vector<8x64xf32>
    %6 = arith.addf %3, %5 : vector<8x64xf32>
    %7 = arith.truncf %6 : vector<8x64xf32> to vector<8x64xbf16>
    %c0_5 = arith.constant 0 : index
    %c0_6 = arith.constant 0 : index
    %8 = vector.load %arg4[%c0_5, %c0_6] : memref<8x64xbf16, #tpu.memory_space<vmem>>, vector<8x64xbf16>
    tpu.vector_store %arg4[%c0_5, %c0_6], %7 {strides = array<i32>} : memref<8x64xbf16, #tpu.memory_space<vmem>>, vector<8x64xbf16>,
    return
  }
  func.func @transform_0(%arg0: i32) -> (i32, i32) {
    %c0_i32 = arith.constant 0 : i32
    %c0_i32_0 = arith.constant 0 : i32
    return %arg0, %c0_i32 : i32, i32
  }
  func.func @transform_1(%arg0: i32) -> (i32, i32) {
    %c0_i32 = arith.constant 0 : i32
    %c0_i32_0 = arith.constant 0 : i32
    %c0_i32_1 = arith.constant 0 : i32
    return %c0_i32, %c0_i32_0 : i32, i32
  }
  func.func @transform_2(%arg0: i32) -> (i32, i32) {
    %c0_i32 = arith.constant 0 : i32
    %c0_i32_0 = arith.constant 0 : i32
    %c0_i32_1 = arith.constant 0 : i32
    return %c0_i32, %c0_i32_0 : i32, i32
  }
  func.func @transform_3(%arg0: i32) -> (i32, i32) {
    %c0_i32 = arith.constant 0 : i32
    %c0_i32_0 = arith.constant 0 : i32
    return %arg0, %c0_i32 : i32, i32
  }
}

module attributes {stable_mosaic.version = 11 : i64} {
  func.func @_fused_attn_kernel(%arg0: i32, %arg1: i32, %arg2: memref<1x2x8x16xbf16, #tpu.memory_space<vmem>>, %arg3: memref<1x2x8x16xbf16, #tpu.memory_space<vmem>>, %arg4: memref<1x2x8x16xbf16, #tpu.memory_space<vmem>>, %arg5: memref<1x2x4x16xbf16, #tpu.memory_space<vmem>>, %arg6: memref<1x2x4x16xbf16, #tpu.memory_space<vmem>>, %arg7: memref<1x2x4x16xbf16, #tpu.memory_space<vmem>>, %arg8: memref<1x2x8x4xf32, #tpu.memory_space<vmem>>, %arg9: memref<1x2x4x16xbf16, #tpu.memory_space<vmem>>, %arg10: memref<1x2x4x16xbf16, #tpu.memory_space<vmem>>, %arg11: memref<1x2x8x4xf32, #tpu.memory_space<vmem>>, %arg12: memref<1x1x2x8x16xbf16, #tpu.memory_space<vmem>>, %arg13: memref<1x1x2x8x16xbf16, #tpu.memory_space<vmem>>, %arg14: memref<1x1x2x8x8xf32, #tpu.memory_space<vmem>>, %arg15: memref<96x32xbf16, #tpu.memory_space<vmem>>, %arg16: memref<1x32xf32, #tpu.memory_space<vmem>>, %arg17: memref<1x8x32xf32, #tpu.memory_space<vmem>>, %arg18: memref<4x2x8x1xf32, #tpu.memory_space<vmem>>, %arg19: memref<8x96xf32, #tpu.memory_space<vmem>>, %arg20: memref<2x8x16xf32, #tpu.memory_space<vmem>>) attributes {dimension_semantics = [#tpu.dimension_semantics<parallel>, #tpu.dimension_semantics<arbitrary>], iteration_bounds = array<i64: 2, 4>, scalar_prefetch = 0 : i64, scratch_operands = 3 : i64, tpu.core_type = #tpu.core_type<tc>, window_params = [{transform_indices = @transform_0, window_bounds = array<i64: 1, 2, 8, 16>}, {transform_indices = @transform_1, window_bounds = array<i64: 1, 2, 8, 16>}, {transform_indices = @transform_2, window_bounds = array<i64: 1, 2, 8, 16>}, {transform_indices = @transform_3, window_bounds = array<i64: 1, 2, 4, 16>}, {transform_indices = @transform_4, window_bounds = array<i64: 1, 2, 4, 16>}, {transform_indices = @transform_5, window_bounds = array<i64: 1, 2, 4, 16>}, {transform_indices = @transform_6, window_bounds = array<i64: 1, 2, 8, 4>}, {transform_indices = @transform_7, window_bounds = array<i64: 1, 2, 4, 16>}, {transform_indices = @transform_8, window_bounds = array<i64: 1, 2, 4, 16>}, {transform_indices = @transform_9, window_bounds = array<i64: 1, 2, 8, 4>}, {transform_indices = @transform_10, window_bounds = array<i64: 1, 1, 2, 8, 16>}, {transform_indices = @transform_11, window_bounds = array<i64: 1, 1, 2, 8, 16>}, {transform_indices = @transform_12, window_bounds = array<i64: 1, 1, 2, 8, 8>}, {pipeline_mode = #tpu.pipeline_mode<synchronous>, transform_indices = @transform_13, window_bounds = array<i64: 96, 32>}, {pipeline_mode = #tpu.pipeline_mode<synchronous>, transform_indices = @transform_14, window_bounds = array<i64: 1, 32>}, {transform_indices = @transform_15, window_bounds = array<i64: 1, 8, 32>}]} {
    %c0_i32 = arith.constant 0 : i32
    %0 = arith.cmpi eq, %arg1, %c0_i32 : i32
    %1 = arith.extui %0 : i1 to i32
    %c0_i32_0 = arith.constant 0 : i32
    %2 = arith.cmpi ne, %1, %c0_i32_0 : i32
    scf.if %2 {
      %c0_32 = arith.constant 0 : index
      %c0_33 = arith.constant 0 : index
      %c0_34 = arith.constant 0 : index
      %c0_35 = arith.constant 0 : index
      %36 = vector.load %arg4[%c0_32, %c0_33, %c0_34, %c0_35] : memref<1x2x8x16xbf16, #tpu.memory_space<vmem>>, vector<1x2x8x16xbf16>
      %37 = vector.shape_cast %36 : vector<1x2x8x16xbf16> to vector<2x8x16xbf16>
      %c0_36 = arith.constant 0 : index
      %c0_37 = arith.constant 0 : index
      %c0_38 = arith.constant 0 : index
      %c0_39 = arith.constant 0 : index
      %38 = vector.load %arg9[%c0_36, %c0_37, %c0_38, %c0_39] : memref<1x2x4x16xbf16, #tpu.memory_space<vmem>>, vector<1x2x4x16xbf16>
      %39 = vector.shape_cast %38 : vector<1x2x4x16xbf16> to vector<2x4x16xbf16>
      "tpu.trace_start"() <{level = 10 : i32, message = "hqd,hnd->hqn"}> : () -> ()
      %cst_40 = arith.constant dense<0.000000e+00> : vector<2x8x4xf32>
      %40 = tpu.matmul %37, %39, %cst_40 {dimension_numbers = #tpu.dot_dimension_numbers<[2], [2], [1], [1], [0, 0, 0, 1, 1, 1], [0], [0]>} : vector<2x8x16xbf16>, vector<2x4x16xbf16>, vector<2x8x4xf32> -> vector<2x8x4xf32>
      "tpu.trace_stop"() : () -> ()
      %c0_41 = arith.constant 0 : index
      %c0_42 = arith.constant 0 : index
      %c0_43 = arith.constant 0 : index
      %c0_44 = arith.constant 0 : index
      %41 = vector.load %arg11[%c0_41, %c0_42, %c0_43, %c0_44] : memref<1x2x8x4xf32, #tpu.memory_space<vmem>>, vector<1x2x8x4xf32>
      %42 = vector.shape_cast %41 : vector<1x2x8x4xf32> to vector<2x8x4xf32>
      %43 = arith.addf %40, %42 : vector<2x8x4xf32>
      %cst_45 = arith.constant dense<0xFF800000> : vector<2x8xf32>
      %44 = vector.multi_reduction <maximumf>, %43, %cst_45 [2] : vector<2x8x4xf32> to vector<2x8xf32>
      %45 = vector.shape_cast %44 : vector<2x8xf32> to vector<2x8x1xf32>
      %46 = vector.broadcast %45 : vector<2x8x1xf32> to vector<2x8x4xf32>
      %47 = arith.subf %43, %46 : vector<2x8x4xf32>
      %48 = math.exp %47 : vector<2x8x4xf32>
      %cst_46 = arith.constant dense<0.000000e+00> : vector<2x8xf32>
      %49 = vector.multi_reduction <add>, %48, %cst_46 [2] : vector<2x8x4xf32> to vector<2x8xf32>
      %50 = vector.shape_cast %49 : vector<2x8xf32> to vector<2x8x1xf32>
      %51 = tpu.reciprocal %50 {approx = true} : vector<2x8x1xf32> -> vector<2x8x1xf32>
      %52 = vector.broadcast %51 : vector<2x8x1xf32> to vector<2x8x4xf32>
      %53 = arith.mulf %48, %52 : vector<2x8x4xf32>
      %54 = arith.truncf %53 : vector<2x8x4xf32> to vector<2x8x4xbf16>
      %c0_47 = arith.constant 0 : index
      %c0_48 = arith.constant 0 : index
      %c0_49 = arith.constant 0 : index
      %c0_50 = arith.constant 0 : index
      %55 = vector.load %arg10[%c0_47, %c0_48, %c0_49, %c0_50] : memref<1x2x4x16xbf16, #tpu.memory_space<vmem>>, vector<1x2x4x16xbf16>
      %56 = vector.shape_cast %55 : vector<1x2x4x16xbf16> to vector<2x4x16xbf16>
      "tpu.trace_start"() <{level = 10 : i32, message = "hqn,hnd->hqd"}> : () -> ()
      %cst_51 = arith.constant dense<0.000000e+00> : vector<2x8x16xf32>
      %57 = tpu.matmul %54, %56, %cst_51 {dimension_numbers = #tpu.dot_dimension_numbers<[2], [1], [1], [2], [0, 0, 0, 1, 1, 2], [0], [0]>} : vector<2x8x4xbf16>, vector<2x4x16xbf16>, vector<2x8x16xf32> -> vector<2x8x16xf32>
      "tpu.trace_stop"() : () -> ()
      %c0_52 = arith.constant 0 : index
      %c0_53 = arith.constant 0 : index
      %c0_54 = arith.constant 0 : index
      %c0_55 = arith.constant 0 : index
      %58 = vector.load %arg5[%c0_52, %c0_53, %c0_54, %c0_55] : memref<1x2x4x16xbf16, #tpu.memory_space<vmem>>, vector<1x2x4x16xbf16>
      %59 = vector.shape_cast %58 : vector<1x2x4x16xbf16> to vector<2x4x16xbf16>
      %c0_56 = arith.constant 0 : index
      %c0_57 = arith.constant 0 : index
      %c0_58 = arith.constant 0 : index
      %c0_59 = arith.constant 0 : index
      %60 = vector.load %arg7[%c0_56, %c0_57, %c0_58, %c0_59] : memref<1x2x4x16xbf16, #tpu.memory_space<vmem>>, vector<1x2x4x16xbf16>
      %61 = vector.shape_cast %60 : vector<1x2x4x16xbf16> to vector<2x4x16xbf16>
      %62 = arith.addf %59, %61 : vector<2x4x16xbf16>
      %c0_60 = arith.constant 0 : index
      %c0_61 = arith.constant 0 : index
      %c0_62 = arith.constant 0 : index
      %c0_63 = arith.constant 0 : index
      %63 = vector.load %arg2[%c0_60, %c0_61, %c0_62, %c0_63] : memref<1x2x8x16xbf16, #tpu.memory_space<vmem>>, vector<1x2x8x16xbf16>
      %64 = vector.shape_cast %63 : vector<1x2x8x16xbf16> to vector<2x8x16xbf16>
      "tpu.trace_start"() <{level = 10 : i32, message = "hqd,hnd->hqn"}> : () -> ()
      %cst_64 = arith.constant dense<0.000000e+00> : vector<2x8x4xf32>
      %65 = tpu.matmul %64, %62, %cst_64 {dimension_numbers = #tpu.dot_dimension_numbers<[2], [2], [1], [1], [0, 0, 0, 1, 1, 1], [0], [0]>} : vector<2x8x16xbf16>, vector<2x4x16xbf16>, vector<2x8x4xf32> -> vector<2x8x4xf32>
      "tpu.trace_stop"() : () -> ()
      %c0_65 = arith.constant 0 : index
      %c0_66 = arith.constant 0 : index
      %c0_67 = arith.constant 0 : index
      %c0_68 = arith.constant 0 : index
      %66 = vector.load %arg8[%c0_65, %c0_66, %c0_67, %c0_68] : memref<1x2x8x4xf32, #tpu.memory_space<vmem>>, vector<1x2x8x4xf32>
      %67 = vector.shape_cast %66 : vector<1x2x8x4xf32> to vector<2x8x4xf32>
      %68 = arith.addf %65, %67 : vector<2x8x4xf32>
      %cst_69 = arith.constant dense<0xFF800000> : vector<2x8xf32>
      %69 = vector.multi_reduction <maximumf>, %68, %cst_69 [2] : vector<2x8x4xf32> to vector<2x8xf32>
      %70 = vector.shape_cast %69 : vector<2x8xf32> to vector<2x8x1xf32>
      %71 = vector.broadcast %70 : vector<2x8x1xf32> to vector<2x8x4xf32>
      %72 = arith.subf %68, %71 : vector<2x8x4xf32>
      %73 = math.exp %72 : vector<2x8x4xf32>
      %cst_70 = arith.constant dense<0.000000e+00> : vector<2x8xf32>
      %74 = vector.multi_reduction <add>, %73, %cst_70 [2] : vector<2x8x4xf32> to vector<2x8xf32>
      %75 = vector.shape_cast %74 : vector<2x8xf32> to vector<2x8x1xf32>
      %76 = vector.broadcast %75 : vector<2x8x1xf32> to vector<2x8x4xf32>
      %77 = arith.divf %73, %76 : vector<2x8x4xf32>
      %78 = arith.truncf %77 : vector<2x8x4xf32> to vector<2x8x4xbf16>
      %c0_71 = arith.constant 0 : index
      %c0_72 = arith.constant 0 : index
      %c0_73 = arith.constant 0 : index
      %c0_74 = arith.constant 0 : index
      %79 = vector.load %arg6[%c0_71, %c0_72, %c0_73, %c0_74] : memref<1x2x4x16xbf16, #tpu.memory_space<vmem>>, vector<1x2x4x16xbf16>
      %80 = vector.shape_cast %79 : vector<1x2x4x16xbf16> to vector<2x4x16xbf16>
      "tpu.trace_start"() <{level = 10 : i32, message = "hqn,hnd->hqd"}> : () -> ()
      %cst_75 = arith.constant dense<0.000000e+00> : vector<2x8x16xf32>
      %81 = tpu.matmul %78, %80, %cst_75 {dimension_numbers = #tpu.dot_dimension_numbers<[2], [1], [1], [2], [0, 0, 0, 1, 1, 2], [0], [0]>} : vector<2x8x4xbf16>, vector<2x4x16xbf16>, vector<2x8x16xf32> -> vector<2x8x16xf32>
      "tpu.trace_stop"() : () -> ()
      %82 = vector.extract_strided_slice %77 {offsets = [0, 0, 0], sizes = [2, 8, 1], strides = [1, 1, 1]} : vector<2x8x4xf32> to vector<2x8x1xf32>
      %c0_76 = arith.constant 0 : index
      %c0_77 = arith.constant 0 : index
      %c0_78 = arith.constant 0 : index
      %c0_79 = arith.constant 0 : index
      %83 = vector.load %arg18[%c0_76, %c0_77, %c0_78, %c0_79] : memref<4x2x8x1xf32, #tpu.memory_space<vmem>>, vector<1x2x8x1xf32>
      %84 = vector.shape_cast %83 : vector<1x2x8x1xf32> to vector<2x8x1xf32>
      %85 = vector.shape_cast %82 : vector<2x8x1xf32> to vector<1x2x8x1xf32>
      tpu.vector_store %arg18[%c0_76, %c0_77, %c0_78, %c0_79], %85 {strides = array<i32>} : memref<4x2x8x1xf32, #tpu.memory_space<vmem>>, vector<1x2x8x1xf32>,
      %86 = vector.extract_strided_slice %77 {offsets = [0, 0, 1], sizes = [2, 8, 1], strides = [1, 1, 1]} : vector<2x8x4xf32> to vector<2x8x1xf32>
      %c1 = arith.constant 1 : index
      %c0_80 = arith.constant 0 : index
      %c0_81 = arith.constant 0 : index
      %c0_82 = arith.constant 0 : index
      %87 = vector.load %arg18[%c1, %c0_80, %c0_81, %c0_82] : memref<4x2x8x1xf32, #tpu.memory_space<vmem>>, vector<1x2x8x1xf32>
      %88 = vector.shape_cast %87 : vector<1x2x8x1xf32> to vector<2x8x1xf32>
      %89 = vector.shape_cast %86 : vector<2x8x1xf32> to vector<1x2x8x1xf32>
      tpu.vector_store %arg18[%c1, %c0_80, %c0_81, %c0_82], %89 {strides = array<i32>} : memref<4x2x8x1xf32, #tpu.memory_space<vmem>>, vector<1x2x8x1xf32>,
      %90 = vector.extract_strided_slice %77 {offsets = [0, 0, 2], sizes = [2, 8, 1], strides = [1, 1, 1]} : vector<2x8x4xf32> to vector<2x8x1xf32>
      %c2 = arith.constant 2 : index
      %c0_83 = arith.constant 0 : index
      %c0_84 = arith.constant 0 : index
      %c0_85 = arith.constant 0 : index
      %91 = vector.load %arg18[%c2, %c0_83, %c0_84, %c0_85] : memref<4x2x8x1xf32, #tpu.memory_space<vmem>>, vector<1x2x8x1xf32>
      %92 = vector.shape_cast %91 : vector<1x2x8x1xf32> to vector<2x8x1xf32>
      %93 = vector.shape_cast %90 : vector<2x8x1xf32> to vector<1x2x8x1xf32>
      tpu.vector_store %arg18[%c2, %c0_83, %c0_84, %c0_85], %93 {strides = array<i32>} : memref<4x2x8x1xf32, #tpu.memory_space<vmem>>, vector<1x2x8x1xf32>,
      %94 = vector.extract_strided_slice %77 {offsets = [0, 0, 3], sizes = [2, 8, 1], strides = [1, 1, 1]} : vector<2x8x4xf32> to vector<2x8x1xf32>
      %c3 = arith.constant 3 : index
      %c0_86 = arith.constant 0 : index
      %c0_87 = arith.constant 0 : index
      %c0_88 = arith.constant 0 : index
      %95 = vector.load %arg18[%c3, %c0_86, %c0_87, %c0_88] : memref<4x2x8x1xf32, #tpu.memory_space<vmem>>, vector<1x2x8x1xf32>
      %96 = vector.shape_cast %95 : vector<1x2x8x1xf32> to vector<2x8x1xf32>
      %97 = vector.shape_cast %94 : vector<2x8x1xf32> to vector<1x2x8x1xf32>
      tpu.vector_store %arg18[%c3, %c0_86, %c0_87, %c0_88], %97 {strides = array<i32>} : memref<4x2x8x1xf32, #tpu.memory_space<vmem>>, vector<1x2x8x1xf32>,
      %98 = vector.extract_strided_slice %57 {offsets = [0, 0, 0], sizes = [1, 8, 16], strides = [1, 1, 1]} : vector<2x8x16xf32> to vector<1x8x16xf32>
      %99 = vector.shape_cast %98 : vector<1x8x16xf32> to vector<8x16xf32>
      %c0_89 = arith.constant 0 : index
      %c0_90 = arith.constant 0 : index
      %100 = vector.load %arg19[%c0_89, %c0_90] : memref<8x96xf32, #tpu.memory_space<vmem>>, vector<8x16xf32>
      tpu.vector_store %arg19[%c0_89, %c0_90], %99 {strides = array<i32>} : memref<8x96xf32, #tpu.memory_space<vmem>>, vector<8x16xf32>,
      %101 = vector.extract_strided_slice %81 {offsets = [0, 0, 0], sizes = [1, 8, 16], strides = [1, 1, 1]} : vector<2x8x16xf32> to vector<1x8x16xf32>
      %102 = vector.shape_cast %101 : vector<1x8x16xf32> to vector<8x16xf32>
      %c0_91 = arith.constant 0 : index
      %c32 = arith.constant 32 : index
      %103 = vector.load %arg19[%c0_91, %c32] : memref<8x96xf32, #tpu.memory_space<vmem>>, vector<8x16xf32>
      tpu.vector_store %arg19[%c0_91, %c32], %102 {strides = array<i32>} : memref<8x96xf32, #tpu.memory_space<vmem>>, vector<8x16xf32>,
      %104 = vector.extract_strided_slice %57 {offsets = [1, 0, 0], sizes = [1, 8, 16], strides = [1, 1, 1]} : vector<2x8x16xf32> to vector<1x8x16xf32>
      %105 = vector.shape_cast %104 : vector<1x8x16xf32> to vector<8x16xf32>
      %c0_92 = arith.constant 0 : index
      %c16 = arith.constant 16 : index
      %106 = vector.load %arg19[%c0_92, %c16] : memref<8x96xf32, #tpu.memory_space<vmem>>, vector<8x16xf32>
      tpu.vector_store %arg19[%c0_92, %c16], %105 {strides = array<i32>} : memref<8x96xf32, #tpu.memory_space<vmem>>, vector<8x16xf32>,
      %107 = vector.extract_strided_slice %81 {offsets = [1, 0, 0], sizes = [1, 8, 16], strides = [1, 1, 1]} : vector<2x8x16xf32> to vector<1x8x16xf32>
      %108 = vector.shape_cast %107 : vector<1x8x16xf32> to vector<8x16xf32>
      %c0_93 = arith.constant 0 : index
      %c48 = arith.constant 48 : index
      %109 = vector.load %arg19[%c0_93, %c48] : memref<8x96xf32, #tpu.memory_space<vmem>>, vector<8x16xf32>
      tpu.vector_store %arg19[%c0_93, %c48], %108 {strides = array<i32>} : memref<8x96xf32, #tpu.memory_space<vmem>>, vector<8x16xf32>,
      %cst_94 = arith.constant 0.000000e+00 : f32
      %110 = vector.broadcast %cst_94 : f32 to vector<2x8x16xf32>
      %c0_95 = arith.constant 0 : index
      %c0_96 = arith.constant 0 : index
      %c0_97 = arith.constant 0 : index
      %111 = vector.load %arg20[%c0_95, %c0_96, %c0_97] : memref<2x8x16xf32, #tpu.memory_space<vmem>>, vector<2x8x16xf32>
      tpu.vector_store %arg20[%c0_95, %c0_96, %c0_97], %110 {strides = array<i32>} : memref<2x8x16xf32, #tpu.memory_space<vmem>>, vector<2x8x16xf32>,
    } else {
    }
    %c0 = arith.constant 0 : index
    %c0_1 = arith.constant 0 : index
    %c0_2 = arith.constant 0 : index
    %c0_3 = arith.constant 0 : index
    %3 = vector.load %arg3[%c0, %c0_1, %c0_2, %c0_3] : memref<1x2x8x16xbf16, #tpu.memory_space<vmem>>, vector<1x2x8x16xbf16>
    %4 = vector.shape_cast %3 : vector<1x2x8x16xbf16> to vector<2x8x16xbf16>
    %c0_4 = arith.constant 0 : index
    %c0_5 = arith.constant 0 : index
    %c0_6 = arith.constant 0 : index
    %c0_7 = arith.constant 0 : index
    %c0_8 = arith.constant 0 : index
    %5 = vector.load %arg12[%c0_4, %c0_5, %c0_6, %c0_7, %c0_8] : memref<1x1x2x8x16xbf16, #tpu.memory_space<vmem>>, vector<1x1x2x8x16xbf16>
    %6 = vector.shape_cast %5 : vector<1x1x2x8x16xbf16> to vector<2x8x16xbf16>
    "tpu.trace_start"() <{level = 10 : i32, message = "hqd,htd->hqt"}> : () -> ()
    %cst = arith.constant dense<0.000000e+00> : vector<2x8x8xf32>
    %7 = tpu.matmul %4, %6, %cst {dimension_numbers = #tpu.dot_dimension_numbers<[2], [2], [1], [1], [0, 0, 0, 1, 1, 1], [0], [0]>} : vector<2x8x16xbf16>, vector<2x8x16xbf16>, vector<2x8x8xf32> -> vector<2x8x8xf32>
    "tpu.trace_stop"() : () -> ()
    %c0_9 = arith.constant 0 : index
    %c0_10 = arith.constant 0 : index
    %c0_11 = arith.constant 0 : index
    %c0_12 = arith.constant 0 : index
    %c0_13 = arith.constant 0 : index
    %8 = vector.load %arg14[%c0_9, %c0_10, %c0_11, %c0_12, %c0_13] : memref<1x1x2x8x8xf32, #tpu.memory_space<vmem>>, vector<1x1x2x8x8xf32>
    %9 = vector.shape_cast %8 : vector<1x1x2x8x8xf32> to vector<2x8x8xf32>
    %10 = arith.addf %7, %9 : vector<2x8x8xf32>
    %cst_14 = arith.constant dense<0xFF800000> : vector<2x8xf32>
    %11 = vector.multi_reduction <maximumf>, %10, %cst_14 [2] : vector<2x8x8xf32> to vector<2x8xf32>
    %12 = vector.shape_cast %11 : vector<2x8xf32> to vector<2x8x1xf32>
    %13 = vector.broadcast %12 : vector<2x8x1xf32> to vector<2x8x8xf32>
    %14 = arith.subf %10, %13 : vector<2x8x8xf32>
    %15 = math.exp %14 : vector<2x8x8xf32>
    %cst_15 = arith.constant dense<0.000000e+00> : vector<2x8xf32>
    %16 = vector.multi_reduction <add>, %15, %cst_15 [2] : vector<2x8x8xf32> to vector<2x8xf32>
    %17 = vector.shape_cast %16 : vector<2x8xf32> to vector<2x8x1xf32>
    %18 = tpu.reciprocal %17 {approx = true} : vector<2x8x1xf32> -> vector<2x8x1xf32>
    %19 = vector.broadcast %18 : vector<2x8x1xf32> to vector<2x8x8xf32>
    %20 = arith.mulf %15, %19 : vector<2x8x8xf32>
    %21 = arith.truncf %20 : vector<2x8x8xf32> to vector<2x8x8xbf16>
    %c0_16 = arith.constant 0 : index
    %c0_17 = arith.constant 0 : index
    %c0_18 = arith.constant 0 : index
    %c0_19 = arith.constant 0 : index
    %c0_20 = arith.constant 0 : index
    %22 = vector.load %arg13[%c0_16, %c0_17, %c0_18, %c0_19, %c0_20] : memref<1x1x2x8x16xbf16, #tpu.memory_space<vmem>>, vector<1x1x2x8x16xbf16>
    %23 = vector.shape_cast %22 : vector<1x1x2x8x16xbf16> to vector<2x8x16xbf16>
    "tpu.trace_start"() <{level = 10 : i32, message = "hqt,htd->hqd"}> : () -> ()
    %cst_21 = arith.constant dense<0.000000e+00> : vector<2x8x16xf32>
    %24 = tpu.matmul %21, %23, %cst_21 {dimension_numbers = #tpu.dot_dimension_numbers<[2], [1], [1], [2], [0, 0, 0, 1, 1, 2], [0], [0]>} : vector<2x8x8xbf16>, vector<2x8x16xbf16>, vector<2x8x16xf32> -> vector<2x8x16xf32>
    "tpu.trace_stop"() : () -> ()
    %c0_22 = arith.constant 0 : index
    %c0_23 = arith.constant 0 : index
    %c0_24 = arith.constant 0 : index
    %25 = vector.load %arg20[%c0_22, %c0_23, %c0_24] : memref<2x8x16xf32, #tpu.memory_space<vmem>>, vector<2x8x16xf32>
    %26 = arith.index_cast %arg1 : i32 to index
    %c0_25 = arith.constant 0 : index
    %c0_26 = arith.constant 0 : index
    %c0_27 = arith.constant 0 : index
    %27 = vector.load %arg18[%26, %c0_25, %c0_26, %c0_27] : memref<4x2x8x1xf32, #tpu.memory_space<vmem>>, vector<1x2x8x1xf32>
    %28 = vector.shape_cast %27 : vector<1x2x8x1xf32> to vector<2x8x1xf32>
    %29 = vector.broadcast %28 : vector<2x8x1xf32> to vector<2x8x16xf32>
    %30 = arith.mulf %24, %29 : vector<2x8x16xf32>
    %31 = arith.addf %25, %30 : vector<2x8x16xf32>
    %c0_28 = arith.constant 0 : index
    %c0_29 = arith.constant 0 : index
    %c0_30 = arith.constant 0 : index
    %32 = vector.load %arg20[%c0_28, %c0_29, %c0_30] : memref<2x8x16xf32, #tpu.memory_space<vmem>>, vector<2x8x16xf32>
    tpu.vector_store %arg20[%c0_28, %c0_29, %c0_30], %31 {strides = array<i32>} : memref<2x8x16xf32, #tpu.memory_space<vmem>>, vector<2x8x16xf32>,
    %c3_i32 = arith.constant 3 : i32
    %33 = arith.cmpi eq, %arg1, %c3_i32 : i32
    %34 = arith.extui %33 : i1 to i32
    %c0_i32_31 = arith.constant 0 : i32
    %35 = arith.cmpi ne, %34, %c0_i32_31 : i32
    scf.if %35 {
      %c0_32 = arith.constant 0 : index
      %c0_33 = arith.constant 0 : index
      %c0_34 = arith.constant 0 : index
      %36 = vector.load %arg20[%c0_32, %c0_33, %c0_34] : memref<2x8x16xf32, #tpu.memory_space<vmem>>, vector<1x8x16xf32>
      %37 = vector.shape_cast %36 : vector<1x8x16xf32> to vector<8x16xf32>
      %c0_35 = arith.constant 0 : index
      %c64 = arith.constant 64 : index
      %38 = vector.load %arg19[%c0_35, %c64] : memref<8x96xf32, #tpu.memory_space<vmem>>, vector<8x16xf32>
      tpu.vector_store %arg19[%c0_35, %c64], %37 {strides = array<i32>} : memref<8x96xf32, #tpu.memory_space<vmem>>, vector<8x16xf32>,
      %c1 = arith.constant 1 : index
      %c0_36 = arith.constant 0 : index
      %c0_37 = arith.constant 0 : index
      %39 = vector.load %arg20[%c1, %c0_36, %c0_37] : memref<2x8x16xf32, #tpu.memory_space<vmem>>, vector<1x8x16xf32>
      %40 = vector.shape_cast %39 : vector<1x8x16xf32> to vector<8x16xf32>
      %c0_38 = arith.constant 0 : index
      %c80 = arith.constant 80 : index
      %41 = vector.load %arg19[%c0_38, %c80] : memref<8x96xf32, #tpu.memory_space<vmem>>, vector<8x16xf32>
      tpu.vector_store %arg19[%c0_38, %c80], %40 {strides = array<i32>} : memref<8x96xf32, #tpu.memory_space<vmem>>, vector<8x16xf32>,
      %c0_39 = arith.constant 0 : index
      %c0_40 = arith.constant 0 : index
      %42 = vector.load %arg19[%c0_39, %c0_40] : memref<8x96xf32, #tpu.memory_space<vmem>>, vector<8x96xf32>
      %43 = arith.truncf %42 : vector<8x96xf32> to vector<8x96xbf16>
      %c0_41 = arith.constant 0 : index
      %c0_42 = arith.constant 0 : index
      %44 = vector.load %arg15[%c0_41, %c0_42] : memref<96x32xbf16, #tpu.memory_space<vmem>>, vector<96x32xbf16>
      %cst_43 = arith.constant dense<0.000000e+00> : vector<8x32xf32>
      %45 = tpu.matmul %43, %44, %cst_43 {dimension_numbers = #tpu.dot_dimension_numbers<[1], [0], [0], [1], [0, 0, 1, 1], [], []>} : vector<8x96xbf16>, vector<96x32xbf16>, vector<8x32xf32> -> vector<8x32xf32>
      %c0_44 = arith.constant 0 : index
      %c0_45 = arith.constant 0 : index
      %46 = vector.load %arg16[%c0_44, %c0_45] : memref<1x32xf32, #tpu.memory_space<vmem>>, vector<1x32xf32>
      %47 = vector.broadcast %46 : vector<1x32xf32> to vector<8x32xf32>
      %48 = arith.addf %45, %47 : vector<8x32xf32>
      %c0_46 = arith.constant 0 : index
      %c0_47 = arith.constant 0 : index
      %c0_48 = arith.constant 0 : index
      %49 = vector.load %arg17[%c0_46, %c0_47, %c0_48] : memref<1x8x32xf32, #tpu.memory_space<vmem>>, vector<1x8x32xf32>
      %50 = vector.shape_cast %49 : vector<1x8x32xf32> to vector<8x32xf32>
      %51 = vector.shape_cast %48 : vector<8x32xf32> to vector<1x8x32xf32>
      tpu.vector_store %arg17[%c0_46, %c0_47, %c0_48], %51 {strides = array<i32>} : memref<1x8x32xf32, #tpu.memory_space<vmem>>, vector<1x8x32xf32>,
    } else {
    }
    return
  }
  func.func @transform_0(%arg0: i32, %arg1: i32) -> (i32, i32, i32, i32) {
    %c0_i32 = arith.constant 0 : i32
    %c0_i32_0 = arith.constant 0 : i32
    %c0_i32_1 = arith.constant 0 : i32
    %c0_i32_2 = arith.constant 0 : i32
    return %arg0, %c0_i32, %c0_i32_0, %c0_i32_1 : i32, i32, i32, i32
  }
  func.func @transform_1(%arg0: i32, %arg1: i32) -> (i32, i32, i32, i32) {
    %c0_i32 = arith.constant 0 : i32
    %c0_i32_0 = arith.constant 0 : i32
    %c0_i32_1 = arith.constant 0 : i32
    %c0_i32_2 = arith.constant 0 : i32
    return %arg0, %c0_i32, %c0_i32_0, %c0_i32_1 : i32, i32, i32, i32
  }
  func.func @transform_2(%arg0: i32, %arg1: i32) -> (i32, i32, i32, i32) {
    %c0_i32 = arith.constant 0 : i32
    %c0_i32_0 = arith.constant 0 : i32
    %c0_i32_1 = arith.constant 0 : i32
    %c0_i32_2 = arith.constant 0 : i32
    return %arg0, %c0_i32, %c0_i32_0, %c0_i32_1 : i32, i32, i32, i32
  }
  func.func @transform_3(%arg0: i32, %arg1: i32) -> (i32, i32, i32, i32) {
    %c0_i32 = arith.constant 0 : i32
    %c0_i32_0 = arith.constant 0 : i32
    %c0_i32_1 = arith.constant 0 : i32
    %c0_i32_2 = arith.constant 0 : i32
    return %arg0, %c0_i32, %c0_i32_0, %c0_i32_1 : i32, i32, i32, i32
  }
  func.func @transform_4(%arg0: i32, %arg1: i32) -> (i32, i32, i32, i32) {
    %c0_i32 = arith.constant 0 : i32
    %c0_i32_0 = arith.constant 0 : i32
    %c0_i32_1 = arith.constant 0 : i32
    %c0_i32_2 = arith.constant 0 : i32
    return %arg0, %c0_i32, %c0_i32_0, %c0_i32_1 : i32, i32, i32, i32
  }
  func.func @transform_5(%arg0: i32, %arg1: i32) -> (i32, i32, i32, i32) {
    %c0_i32 = arith.constant 0 : i32
    %c0_i32_0 = arith.constant 0 : i32
    %c0_i32_1 = arith.constant 0 : i32
    %c0_i32_2 = arith.constant 0 : i32
    return %arg0, %c0_i32, %c0_i32_0, %c0_i32_1 : i32, i32, i32, i32
  }
  func.func @transform_6(%arg0: i32, %arg1: i32) -> (i32, i32, i32, i32) {
    %c0_i32 = arith.constant 0 : i32
    %c0_i32_0 = arith.constant 0 : i32
    %c0_i32_1 = arith.constant 0 : i32
    %c0_i32_2 = arith.constant 0 : i32
    return %arg0, %c0_i32, %c0_i32_0, %c0_i32_1 : i32, i32, i32, i32
  }
  func.func @transform_7(%arg0: i32, %arg1: i32) -> (i32, i32, i32, i32) {
    %c0_i32 = arith.constant 0 : i32
    %c0_i32_0 = arith.constant 0 : i32
    %c0_i32_1 = arith.constant 0 : i32
    %c0_i32_2 = arith.constant 0 : i32
    return %arg0, %c0_i32, %c0_i32_0, %c0_i32_1 : i32, i32, i32, i32
  }
  func.func @transform_8(%arg0: i32, %arg1: i32) -> (i32, i32, i32, i32) {
    %c0_i32 = arith.constant 0 : i32
    %c0_i32_0 = arith.constant 0 : i32
    %c0_i32_1 = arith.constant 0 : i32
    %c0_i32_2 = arith.constant 0 : i32
    return %arg0, %c0_i32, %c0_i32_0, %c0_i32_1 : i32, i32, i32, i32
  }
  func.func @transform_9(%arg0: i32, %arg1: i32) -> (i32, i32, i32, i32) {
    %c0_i32 = arith.constant 0 : i32
    %c0_i32_0 = arith.constant 0 : i32
    %c0_i32_1 = arith.constant 0 : i32
    %c0_i32_2 = arith.constant 0 : i32
    return %arg0, %c0_i32, %c0_i32_0, %c0_i32_1 : i32, i32, i32, i32
  }
  func.func @transform_10(%arg0: i32, %arg1: i32) -> (i32, i32, i32, i32, i32) {
    %c0_i32 = arith.constant 0 : i32
    %c0_i32_0 = arith.constant 0 : i32
    %c0_i32_1 = arith.constant 0 : i32
    %c0_i32_2 = arith.constant 0 : i32
    return %arg0, %arg1, %c0_i32, %c0_i32_0, %c0_i32_1 : i32, i32, i32, i32, i32
  }
  func.func @transform_11(%arg0: i32, %arg1: i32) -> (i32, i32, i32, i32, i32) {
    %c0_i32 = arith.constant 0 : i32
    %c0_i32_0 = arith.constant 0 : i32
    %c0_i32_1 = arith.constant 0 : i32
    %c0_i32_2 = arith.constant 0 : i32
    return %arg0, %arg1, %c0_i32, %c0_i32_0, %c0_i32_1 : i32, i32, i32, i32, i32
  }
  func.func @transform_12(%arg0: i32, %arg1: i32) -> (i32, i32, i32, i32, i32) {
    %c0_i32 = arith.constant 0 : i32
    %c0_i32_0 = arith.constant 0 : i32
    %c0_i32_1 = arith.constant 0 : i32
    %c0_i32_2 = arith.constant 0 : i32
    return %arg0, %arg1, %c0_i32, %c0_i32_0, %c0_i32_1 : i32, i32, i32, i32, i32
  }
  func.func @transform_13(%arg0: i32, %arg1: i32) -> (i32, i32) {
    %c0_i32 = arith.constant 0 : i32
    %c0_i32_0 = arith.constant 0 : i32
    %c0_i32_1 = arith.constant 0 : i32
    return %c0_i32, %c0_i32_0 : i32, i32
  }
  func.func @transform_14(%arg0: i32, %arg1: i32) -> (i32, i32) {
    %c0_i32 = arith.constant 0 : i32
    %c0_i32_0 = arith.constant 0 : i32
    %c0_i32_1 = arith.constant 0 : i32
    return %c0_i32, %c0_i32_0 : i32, i32
  }
  func.func @transform_15(%arg0: i32, %arg1: i32) -> (i32, i32, i32) {
    %c0_i32 = arith.constant 0 : i32
    %c0_i32_0 = arith.constant 0 : i32
    %c0_i32_1 = arith.constant 0 : i32
    return %arg0, %c0_i32, %c0_i32_0 : i32, i32, i32
  }
}

</mosaic_0001>

<bundles_post_ra>
// kernel: multi_head_hierarchical_attention.5
= control target key start
LH: loop header
LB: loop body
LE: loop exit
PB: predicated region body
PF: predicated region fallthrough
CT: control target
= control target key end

     0   :  { %v124_v0 = vmov 0.0   ;;  %vm125_vm0 = vmmov 0   ;;  %vm41_vm1 = vcmask 261120   ;;  %vm94_vm2 = vcmask 781312   ;;  %s167_s1 = inlined_call_operand.vmem [shape: bf16[32,96], index: 1, kind: input, shape index: {}]   ;;  %s168_s0 = inlined_call_operand.vmem [shape: f32[16,32], index: 0, kind: input, shape index: {}]   ;;  %s169_s2 = inlined_call_operand.vmem [shape: f32[1,96], index: 2, kind: input, shape index: {}]   ;;  %s170_s3 = inlined_call_operand.vmem [shape: bf16[16,96], index: 3, kind: output, shape index: {}]  }
   0x1   :  { %112 = vmatprep.subr.bf16.mxu0 %v124_v0  ;;  %v122_v1 = vld [vmem:[%s167_s1 + $0x8] sm:$0xff]   ;;  %116 = vmatprep.mubr.msk.bf16.mxu0 %vm125_vm0, %v124_v0  ;;  %v123_v2 = vld [vmem:[%s167_s1] sm:$0xff]  }
   0x2   :  { %113 = vmatpush3.bf16.msra.mxu0 %v122_v1  ;;  %v15_v3 = vld [vmem:[%s168_s0] sm:$0xff]  ;;  %v16_v4 = vld [vmem:[%s168_s0 + $0x8] sm:$0xff] }
   0x3   :  { %114 = vmatprep.subr.bf16.mxu0 %v124_v0  ;;  %v17_v5 = vpack.c.bf16 %v16_v4, %v15_v3  ;;  %v101_v6 = vld [vmem:[%s169_s2] ss:$0 sm:$0xff] }
   0x6   :  { %115 = vmatpush3.bf16.msra.mxu0 %v123_v2 }
   0x9   :  { %117 = vmatmul.mubr.msk.bf16.vlgmr.msra.gmra.mxu0 %vm41_vm1, %v17_v5 }
  0xc9   :  { %v79_v7 = vpop.f32.mrf.mxu0 }
  0xca   :  { %v80_v8 = vadd.f32 %v101_v6, %v79_v7 }
  0xcb   :  { %v118_v9 = vpop.f32.mrf.mxu0 }
  0xcc   :  { %v107_v10 = vpack.c.bf16 %v80_v8, %v80_v8 }
  0xcd   :  { %v82_v11 = vpop.f32.mrf.mxu0 }
  0xce   :  { %95 = vst.msk [vmem:[%s170_s3] sm:$0xf] %vm94_vm2, %v107_v10  ;;  %v83_v12 = vadd.f32 %v101_v6, %v82_v11 }
  0xcf   :  { %v119_v13 = vpop.f32.mrf.mxu0 }
  0xd0   :  { %v108_v14 = vpack.c.bf16 %v83_v12, %v83_v12 }
  0xd2   :  { %96 = vst.msk [vmem:[%s170_s3 + $0x4] sm:$0xf] %vm94_vm2, %v108_v14 }

// kernel: multi_head_hierarchical_attention.6
= control target key start
LH: loop header
LB: loop body
LE: loop exit
PB: predicated region body
PF: predicated region fallthrough
CT: control target
= control target key end

     0   :  { %v313_v0 = vmov 0.0   ;;  %vm314_vm0 = vmmov 0   ;;  %vm61_vm1 = vcmask 261120   ;;  %vm106_vm2 = vcmask 257024   ;;  %s426_s3 = inlined_call_operand.vmem [shape: bf16[32,32], index: 3, kind: input, shape index: {}]   ;;  %s427_s4 = inlined_call_operand.vmem [shape: bf16[32,32], index: 4, kind: input, shape index: {}]   ;;  %s428_s0 = inlined_call_operand.vmem [shape: f32[8,32], index: 0, kind: input, shape index: {}]   ;;  %s429_s1 = inlined_call_operand.vmem [shape: f32[8,32], index: 1, kind: input, shape index: {}]   ;;  %s430_s5 = inlined_call_operand.vmem [shape: bf16[32,32], index: 5, kind: input, shape index: {}]   ;;  %s431_s2 = inlined_call_operand.vmem [shape: f32[8,32], index: 2, kind: input, shape index: {}]   ;;  %s432_s6 = inlined_call_operand.vmem [shape: f32[1,32], index: 6, kind: input, shape index: {}]   ;;  %s433_s7 = inlined_call_operand.vmem [shape: f32[1,32], index: 7, kind: input, shape index: {}]   ;;  %s434_s9 = inlined_call_operand.vmem [shape: bf16[8,32], index: 9, kind: output, shape index: {0}]   ;;  %s435_s10 = inlined_call_operand.vmem [shape: bf16[8,32], index: 10, kind: output, shape index: {1}]   ;;  %s436_s8 = inlined_call_operand.vmem [shape: f32[1,32], index: 8, kind: input, shape index: {}]   ;;  %s437_s11 = inlined_call_operand.vmem [shape: bf16[8,32], index: 11, kind: output, shape index: {2}]  }
   0x1   :  { %281 = vmatprep.subr.bf16.mxu0 %v313_v0  ;;  %v307_v1 = vld [vmem:[%s426_s3 + $0x8] sm:$0xff]   ;;  %289 = vmatprep.subr.bf16.mxu1 %v313_v0  ;;  %v309_v3 = vld [vmem:[%s426_s3] sm:$0xff]  }
   0x2   :  { %v308_v2 = vld [vmem:[%s427_s4 + $0x8] sm:$0xff]   ;;  %285 = vmatprep.mubr.msk.bf16.mxu0 %vm314_vm0, %v313_v0  ;;  %293 = vmatprep.mubr.msk.bf16.mxu1 %vm314_vm0, %v313_v0  ;;  %v36_v4 = vld [vmem:[%s428_s0] sm:$0xff] }
   0x3   :  { %282 = vmatpush3.bf16.msra.mxu0 %v307_v1  ;;  %290 = vmatpush3.bf16.msra.mxu1 %v308_v2  ;;  %v310_v5 = vld [vmem:[%s427_s4] sm:$0xff]   ;;  %v37_v6 = vpack.c.bf16 %v36_v4, %v36_v4  ;;  %v311_v8 = vld [vmem:[%s430_s5 + $0x8] sm:$0xff]  }
   0x4   :  { %283 = vmatprep.subr.bf16.mxu0 %v313_v0  ;;  %291 = vmatprep.subr.bf16.mxu1 %v313_v0  ;;  %v108_v7 = vld [vmem:[%s429_s1] sm:$0xff] }
   0x5   :  { %v109_v9 = vpack.c.bf16 %v108_v7, %v108_v7  ;;  %v312_v10 = vld [vmem:[%s430_s5] sm:$0xff]  }
   0x6   :  { %v178_v11 = vld [vmem:[%s431_s2] sm:$0xff] }
   0x7   :  { %284 = vmatpush3.bf16.msra.mxu0 %v309_v3  ;;  %292 = vmatpush3.bf16.msra.mxu1 %v310_v5  ;;  %v179_v12 = vpack.c.bf16 %v178_v11, %v178_v11  ;;  %v260_v13 = vld [vmem:[%s432_s6] ss:$0 sm:$0xff] }
   0x8   :  { %297 = vmatprep.subr.bf16.mxu0 %v313_v0  ;;  %v264_v14 = vld [vmem:[%s433_s7] ss:$0 sm:$0xff] }
   0x9   :  { %v268_v26 = vld [vmem:[%s436_s8] ss:$0 sm:$0xff] }
   0xa   :  { %286 = vmatmul.mubr.msk.bf16.vlgmr.msra.gmra.mxu0 %vm61_vm1, %v37_v6  ;;  %294 = vmatmul.mubr.msk.bf16.vlgmr.msra.gmra.mxu1 %vm61_vm1, %v109_v9 }
   0xb   :  { %298 = vmatpush3.bf16.msra.mxu0 %v311_v8  ;;  %301 = vmatprep.mubr.msk.bf16.mxu0 %vm314_vm0, %v313_v0 }
   0xc   :  { %299 = vmatprep.subr.bf16.mxu0 %v313_v0 }
   0xf   :  { %300 = vmatpush3.bf16.msra.mxu0 %v312_v10 }
  0x12   :  { %302 = vmatmul.mubr.msk.bf16.vlgmr.msra.gmra.mxu0 %vm61_vm1, %v179_v12 }
  0xca   :  { %v99_v15 = vpop.f32.mrf.mxu0  ;;  %v170_v17 = vpop.f32.mrf.mxu1 }
  0xcb   :  { %v100_v16 = vadd.f32 %v260_v13, %v99_v15  ;;  %v171_v19 = vadd.f32 %v264_v14, %v170_v17 }
  0xcc   :  { %v287_v18 = vpop.f32.mrf.mxu0  ;;  %v295_v21 = vpop.f32.mrf.mxu1 }
  0xcd   :  { %v105_v20 = vpack.c.bf16 %v100_v16, %v100_v16  ;;  %v176_v22 = vpack.c.bf16 %v171_v19, %v171_v19 }
  0xce   :  { %v102_v23 = vpop.f32.mrf.mxu0  ;;  %v173_v24 = vpop.f32.mrf.mxu1 }
  0xcf   :  { %107 = vst.msk [vmem:[%s434_s9] sm:$0xf] %vm106_vm2, %v105_v20  ;;  %177 = vst.msk [vmem:[%s435_s10] sm:$0xf] %vm106_vm2, %v176_v22 }
  0xd0   :  { %v288_v25 = vpop.f32.mrf.mxu0  ;;  %v296_v27 = vpop.f32.mrf.mxu1 }
  0xd2   :  { %v240_v28 = vpop.f32.mrf.mxu0 }
  0xd3   :  { %v241_v29 = vadd.f32 %v268_v26, %v240_v28 }
  0xd4   :  { %v303_v30 = vpop.f32.mrf.mxu0 }
  0xd5   :  { %v246_v31 = vpack.c.bf16 %v241_v29, %v241_v29 }
  0xd6   :  { %v243_v32 = vpop.f32.mrf.mxu0 }
  0xd7   :  { %247 = vst.msk [vmem:[%s437_s11] sm:$0xf] %vm106_vm2, %v246_v31 }
  0xd8   :  { %v304_v33 = vpop.f32.mrf.mxu0 }

// kernel: multi_head_hierarchical_attention.7
= control target key start
LH: loop header
LB: loop body
LE: loop exit
PB: predicated region body
PF: predicated region fallthrough
CT: control target
= control target key end

     0   :  { %vm61_vm0 = vcmask 261120   ;;  %vm171_vm1 = vcmask 257024   ;;  %s604_s2 = inlined_call_operand.vmem [shape: bf16[32,32], index: 2, kind: input, shape index: {}]   ;;  %s605_s3 = inlined_call_operand.vmem [shape: bf16[32,32], index: 3, kind: input, shape index: {}]   ;;  %s606_s0 = inlined_call_operand.vmem [shape: f32[64,32], index: 0, kind: input, shape index: {}]   ;;  %s607_s1 = inlined_call_operand.vmem [shape: f32[64,32], index: 1, kind: input, shape index: {}]   ;;  %s608_s4 = inlined_call_operand.vmem [shape: f32[1,32], index: 4, kind: input, shape index: {}]   ;;  %s609_s5 = inlined_call_operand.vmem [shape: f32[1,32], index: 5, kind: input, shape index: {}]   ;;  %s610_s6 = inlined_call_operand.vmem [shape: bf16[64,32], index: 6, kind: output, shape index: {0}]   ;;  %s611_s7 = inlined_call_operand.vmem [shape: bf16[64,32], index: 7, kind: output, shape index: {1}]  }
   0x1   :  { %v422_v0 = vld [vmem:[%s604_s2 + $0x8] sm:$0xff]   ;;  %v424_v2 = vld [vmem:[%s604_s2] sm:$0xff]   ;;  %v28_v9 = vld [vmem:[%s606_s0 + $0x10] sm:$0xff] }
   0x2   :  { %v423_v1 = vld [vmem:[%s605_s3 + $0x8] sm:$0xff]   ;;  %398 = vmatprep.subr.bf16.mxu0 %v422_v0  ;;  %v425_v3 = vld [vmem:[%s605_s3] sm:$0xff]   ;;  %v29_v10 = vld [vmem:[%s606_s0 + $0x18] sm:$0xff] }
   0x3   :  { %410 = vmatprep.subr.bf16.mxu1 %v423_v1  ;;  %399 = vmatpush3.bf16.msra.mxu0 %v422_v0  ;;  %v26_v4 = vld [vmem:[%s606_s0] sm:$0xff]  ;;  %v27_v5 = vld [vmem:[%s606_s0 + $0x8] sm:$0xff]  ;;  %v35_v12 = vpack.c.bf16 %v29_v10, %v28_v9  ;;  %v182_v13 = vld [vmem:[%s607_s1 + $0x10] sm:$0xff] }
   0x4   :  { %411 = vmatpush3.bf16.msra.mxu1 %v423_v1  ;;  %400 = vmatprep.subr.bf16.mxu0 %v424_v2  ;;  %v180_v6 = vld [vmem:[%s607_s1] sm:$0xff]  ;;  %v34_v7 = vpack.c.bf16 %v27_v5, %v26_v4  ;;  %v181_v8 = vld [vmem:[%s607_s1 + $0x8] sm:$0xff]  ;;  %v183_v14 = vld [vmem:[%s607_s1 + $0x18] sm:$0xff] }
   0x5   :  { %412 = vmatprep.subr.bf16.mxu1 %v425_v3  ;;  %v188_v11 = vpack.c.bf16 %v181_v8, %v180_v6  ;;  %v30_v15 = vld [vmem:[%s606_s0 + $0x20] sm:$0xff]  ;;  %v189_v16 = vpack.c.bf16 %v183_v14, %v182_v13  ;;  %v31_v17 = vld [vmem:[%s606_s0 + $0x28] sm:$0xff]  ;;  %v32_v22 = vld [vmem:[%s606_s0 + $0x30] sm:$0xff] }
   0x6   :  { %402 = vmatprep.mubr.msk.bf16.mxu0 %vm61_vm0, %v34_v7  ;;  %v184_v18 = vld [vmem:[%s607_s1 + $0x20] sm:$0xff]  ;;  %v185_v19 = vld [vmem:[%s607_s1 + $0x28] sm:$0xff]  ;;  %v36_v20 = vpack.c.bf16 %v31_v17, %v30_v15  ;;  %v33_v23 = vld [vmem:[%s606_s0 + $0x38] sm:$0xff] }
   0x7   :  { %401 = vmatpush3.bf16.msra.mxu0 %v424_v2  ;;  %414 = vmatprep.mubr.msk.bf16.mxu1 %vm61_vm0, %v188_v11  ;;  %v190_v21 = vpack.c.bf16 %v185_v19, %v184_v18  ;;  %v186_v24 = vld [vmem:[%s607_s1 + $0x30] sm:$0xff]  ;;  %v187_v25 = vld [vmem:[%s607_s1 + $0x38] sm:$0xff]  ;;  %v37_v26 = vpack.c.bf16 %v33_v23, %v32_v22  ;;  %v340_v28 = vld [vmem:[%s608_s4] ss:$0 sm:$0xff] }
   0x8   :  { %413 = vmatpush3.bf16.msra.mxu1 %v425_v3  ;;  %v191_v27 = vpack.c.bf16 %v187_v25, %v186_v24  ;;  %v355_v29 = vld [vmem:[%s609_s5] ss:$0 sm:$0xff] }
   0xa   :  { %403 = vmatmul.mubr.msk.bf16.vlgmr.msra.gmra.mxu0 %vm61_vm0, %v35_v12 }
   0xb   :  { %415 = vmatmul.mubr.msk.bf16.vlgmr.msra.gmra.mxu1 %vm61_vm0, %v189_v16  ;;  %406 = vmatprep.mubr.msk.bf16.mxu0 %vm61_vm0, %v36_v20 }
   0xc   :  { %418 = vmatprep.mubr.msk.bf16.mxu1 %vm61_vm0, %v190_v21 }
  0x12   :  { %407 = vmatmul.mubr.msk.bf16.gmra.mxu0 %vm61_vm0, %v37_v26 }
  0x13   :  { %419 = vmatmul.mubr.msk.bf16.gmra.mxu1 %vm61_vm0, %v191_v27 }
  0xca   :  { %v404_v30 = vpop.f32.mrf.mxu0 }
  0xcb   :  { %v117_v31 = vadd.f32 %v404_v30, %v340_v28  ;;  %v416_v32 = vpop.f32.mrf.mxu1 }
  0xcc   :  { %v270_v33 = vadd.f32 %v416_v32, %v355_v29  ;;  %v108_v34 = vpop.f32.mrf.mxu0 }
  0xcd   :  { %v372_v35 = vpack.c.bf16 %v117_v31, %v117_v31  ;;  %v109_v36 = vadd.f32 %v340_v28, %v108_v34  ;;  %v261_v37 = vpop.f32.mrf.mxu1 }
  0xce   :  { %v380_v38 = vpack.c.bf16 %v270_v33, %v270_v33  ;;  %v262_v39 = vadd.f32 %v355_v29, %v261_v37  ;;  %v405_v40 = vpop.f32.mrf.mxu0 }
  0xcf   :  { %174 = vst.msk [vmem:[%s610_s6 + $0x8] sm:$0xf] %vm171_vm1, %v372_v35  ;;  %v370_v41 = vpack.c.bf16 %v109_v36, %v109_v36  ;;  %v120_v42 = vadd.f32 %v405_v40, %v340_v28  ;;  %v417_v43 = vpop.f32.mrf.mxu1 }
  0xd0   :  { %326 = vst.msk [vmem:[%s611_s7 + $0x8] sm:$0xf] %vm171_vm1, %v380_v38  ;;  %v378_v44 = vpack.c.bf16 %v262_v39, %v262_v39  ;;  %v273_v45 = vadd.f32 %v417_v43, %v355_v29  ;;  %v111_v46 = vpop.f32.mrf.mxu0 }
  0xd1   :  { %172 = vst.msk [vmem:[%s610_s6] sm:$0xf] %vm171_vm1, %v370_v41  ;;  %v373_v47 = vpack.c.bf16 %v120_v42, %v120_v42  ;;  %v112_v48 = vadd.f32 %v340_v28, %v111_v46  ;;  %v264_v49 = vpop.f32.mrf.mxu1 }
  0xd2   :  { %324 = vst.msk [vmem:[%s611_s7] sm:$0xf] %vm171_vm1, %v378_v44  ;;  %v381_v50 = vpack.c.bf16 %v273_v45, %v273_v45  ;;  %v265_v51 = vadd.f32 %v355_v29, %v264_v49  ;;  %v408_v52 = vpop.f32.mrf.mxu0 }
  0xd3   :  { %175 = vst.msk [vmem:[%s610_s6 + $0xc] sm:$0xf] %vm171_vm1, %v373_v47  ;;  %v371_v53 = vpack.c.bf16 %v112_v48, %v112_v48  ;;  %v133_v54 = vadd.f32 %v408_v52, %v340_v28  ;;  %v420_v55 = vpop.f32.mrf.mxu1 }
  0xd4   :  { %327 = vst.msk [vmem:[%s611_s7 + $0xc] sm:$0xf] %vm171_vm1, %v381_v50  ;;  %v379_v56 = vpack.c.bf16 %v265_v51, %v265_v51  ;;  %v286_v57 = vadd.f32 %v420_v55, %v355_v29  ;;  %v124_v58 = vpop.f32.mrf.mxu0 }
  0xd5   :  { %173 = vst.msk [vmem:[%s610_s6 + $0x4] sm:$0xf] %vm171_vm1, %v371_v53  ;;  %v376_v59 = vpack.c.bf16 %v133_v54, %v133_v54  ;;  %v125_v60 = vadd.f32 %v340_v28, %v124_v58  ;;  %v277_v61 = vpop.f32.mrf.mxu1 }
  0xd6   :  { %325 = vst.msk [vmem:[%s611_s7 + $0x4] sm:$0xf] %vm171_vm1, %v379_v56  ;;  %v384_v62 = vpack.c.bf16 %v286_v57, %v286_v57  ;;  %v278_v63 = vadd.f32 %v355_v29, %v277_v61  ;;  %v409_v0 = vpop.f32.mrf.mxu0 }
  0xd7   :  { %178 = vst.msk [vmem:[%s610_s6 + $0x18] sm:$0xf] %vm171_vm1, %v376_v59  ;;  %v374_v1 = vpack.c.bf16 %v125_v60, %v125_v60  ;;  %v136_v2 = vadd.f32 %v409_v0, %v340_v28  ;;  %v421_v3 = vpop.f32.mrf.mxu1 }
  0xd8   :  { %330 = vst.msk [vmem:[%s611_s7 + $0x18] sm:$0xf] %vm171_vm1, %v384_v62  ;;  %v382_v4 = vpack.c.bf16 %v278_v63, %v278_v63  ;;  %v289_v5 = vadd.f32 %v421_v3, %v355_v29  ;;  %v127_v6 = vpop.f32.mrf.mxu0 }
  0xd9   :  { %176 = vst.msk [vmem:[%s610_s6 + $0x10] sm:$0xf] %vm171_vm1, %v374_v1  ;;  %v377_v7 = vpack.c.bf16 %v136_v2, %v136_v2  ;;  %v128_v8 = vadd.f32 %v340_v28, %v127_v6  ;;  %v280_v9 = vpop.f32.mrf.mxu1 }
  0xda   :  { %328 = vst.msk [vmem:[%s611_s7 + $0x10] sm:$0xf] %vm171_vm1, %v382_v4  ;;  %v385_v10 = vpack.c.bf16 %v289_v5, %v289_v5  ;;  %v281_v11 = vadd.f32 %v355_v29, %v280_v9 }
  0xdb   :  { %179 = vst.msk [vmem:[%s610_s6 + $0x1c] sm:$0xf] %vm171_vm1, %v377_v7  ;;  %v375_v12 = vpack.c.bf16 %v128_v8, %v128_v8 }
  0xdc   :  { %331 = vst.msk [vmem:[%s611_s7 + $0x1c] sm:$0xf] %vm171_vm1, %v385_v10  ;;  %v383_v13 = vpack.c.bf16 %v281_v11, %v281_v11 }
  0xdd   :  { %177 = vst.msk [vmem:[%s610_s6 + $0x14] sm:$0xf] %vm171_vm1, %v375_v12 }
  0xde   :  { %329 = vst.msk [vmem:[%s611_s7 + $0x14] sm:$0xf] %vm171_vm1, %v383_v13 }

// kernel: multi_head_hierarchical_attention.8
= control target key start
LH: loop header
LB: loop body
LE: loop exit
PB: predicated region body
PF: predicated region fallthrough
CT: control target
= control target key end

     0   :  { %v110_v0 = vmov 0.0   ;;  %vm111_vm0 = vmmov 0   ;;  %vm40_vm1 = vcmask 261120   ;;  %vm85_vm2 = vcmask 519168   ;;  %s147_s1 = inlined_call_operand.vmem [shape: bf16[32,64], index: 1, kind: input, shape index: {}]   ;;  %s148_s0 = inlined_call_operand.vmem [shape: f32[8,32], index: 0, kind: input, shape index: {}]   ;;  %s149_s2 = inlined_call_operand.vmem [shape: f32[1,64], index: 2, kind: input, shape index: {}]   ;;  %s150_s3 = inlined_call_operand.vmem [shape: bf16[8,64], index: 3, kind: output, shape index: {}]  }
   0x1   :  { %98 = vmatprep.subr.bf16.mxu0 %v110_v0  ;;  %v108_v1 = vld [vmem:[%s147_s1 + $0x8] sm:$0xff]   ;;  %102 = vmatprep.mubr.msk.bf16.mxu0 %vm111_vm0, %v110_v0  ;;  %v109_v2 = vld [vmem:[%s147_s1] sm:$0xff]  }
   0x2   :  { %99 = vmatpush3.bf16.msra.mxu0 %v108_v1  ;;  %v15_v3 = vld [vmem:[%s148_s0] sm:$0xff] }
   0x3   :  { %100 = vmatprep.subr.bf16.mxu0 %v110_v0  ;;  %v16_v4 = vpack.c.bf16 %v15_v3, %v15_v3  ;;  %v91_v5 = vld [vmem:[%s149_s2] ss:$0 sm:$0xff] }
   0x6   :  { %101 = vmatpush3.bf16.msra.mxu0 %v109_v2 }
   0x9   :  { %103 = vmatmul.mubr.msk.bf16.vlgmr.msra.gmra.mxu0 %vm40_vm1, %v16_v4 }
  0xc9   :  { %v78_v6 = vpop.f32.mrf.mxu0 }
  0xca   :  { %v79_v7 = vadd.f32 %v91_v5, %v78_v6 }
  0xcb   :  { %v104_v8 = vpop.f32.mrf.mxu0 }
  0xcc   :  { %v84_v9 = vpack.c.bf16 %v79_v7, %v79_v7 }
  0xcd   :  { %v81_v10 = vpop.f32.mrf.mxu0 }
  0xce   :  { %86 = vst.msk [vmem:[%s150_s3] sm:$0xf] %vm85_vm2, %v84_v9 }
  0xcf   :  { %v105_v11 = vpop.f32.mrf.mxu0 }

// kernel: multi_head_hierarchical_attention.9
= control target key start
LH: loop header
LB: loop body
LE: loop exit
PB: predicated region body
PF: predicated region fallthrough
CT: control target
= control target key end

     0   :  { %s2716_s0 = inlined_call_operand.vmem [shape: bf16[2,2,8,16], index: 0, kind: input, shape index: {}]   ;;  %s2717_s1 = inlined_call_operand.vmem [shape: bf16[2,2,8,16], index: 1, kind: input, shape index: {}]   ;;  %s2718_s2 = inlined_call_operand.vmem [shape: bf16[2,2,8,16], index: 2, kind: input, shape index: {}]   ;;  %s2719_s3 = inlined_call_operand.vmem [shape: bf16[2,2,4,16], index: 3, kind: input, shape index: {}]   ;;  %s2720_s4 = inlined_call_operand.vmem [shape: bf16[2,2,4,16], index: 4, kind: input, shape index: {}]   ;;  %s2721_s5 = inlined_call_operand.vmem [shape: bf16[2,2,4,16], index: 5, kind: input, shape index: {}]   ;;  %s2722_s6 = inlined_call_operand.vmem [shape: f32[2,2,8,4], index: 6, kind: input, shape index: {}]   ;;  %s2723_s7 = inlined_call_operand.vmem [shape: bf16[2,2,4,16], index: 7, kind: input, shape index: {}]   ;;  %s2724_s8 = inlined_call_operand.vmem [shape: bf16[2,2,4,16], index: 8, kind: input, shape index: {}]   ;;  %s2725_s9 = inlined_call_operand.vmem [shape: f32[2,2,8,4], index: 9, kind: input, shape index: {}]   ;;  %s2726_s10 = inlined_call_operand.vmem [shape: bf16[2,4,2,8,16], index: 10, kind: input, shape index: {}]   ;;  %s2727_s11 = inlined_call_operand.vmem [shape: bf16[2,4,2,8,16], index: 11, kind: input, shape index: {}]   ;;  %s2728_s12 = inlined_call_operand.vmem [shape: f32[2,4,2,8,8], index: 12, kind: input, shape index: {}]   ;;  %s2729_s13 = inlined_call_operand.vmem [shape: bf16[96,32], index: 13, kind: input, shape index: {}]   ;;  %s2730_s14 = inlined_call_operand.vmem [shape: f32[1,32], index: 14, kind: input, shape index: {}]   ;;  %s2731_s15 = inlined_call_operand.hbm [shape: f32[2,8,32], index: 15, kind: output, shape index: {}]  }
   0x1   :  { %2751 = sst [smem:[#allocation23_spill]] %s2716_s0 }
   0x2   :  { %2752 = sst [smem:[#allocation24_spill]] %s2717_s1 }
   0x3   :  { %2753 = sst [smem:[#allocation25_spill]] %s2718_s2 }
   0x4   :  { %2754 = sst [smem:[#allocation26_spill]] %s2719_s3 }
   0x5   :  { %2755 = sst [smem:[#allocation27_spill]] %s2720_s4 }
   0x6   :  { %2756 = sst [smem:[#allocation28_spill]] %s2721_s5 }
   0x7   :  { %2757 = sst [smem:[#allocation29_spill]] %s2722_s6 }
   0x8   :  { %2758 = sst [smem:[#allocation30_spill]] %s2723_s7 }
   0x9   :  { %2759 = sst [smem:[#allocation31_spill]] %s2729_s13 }
   0xa   :  { %2760 = sst [smem:[#allocation32_spill]] %s2730_s14 }
   0xb   :  { %2761 = sst [smem:[#allocation33_spill]] %s2731_s15 }
   0xc   :  { %20 = vsyncpa [#allocation6], 0 }
   0xd   :  { %22 = vsyncpa [#allocation6 + $0x1], 0  ;;  %s2403_s18 = smov 0   ;;  %s2405_s19 = smov 0  }
   0xe   :  { %s2407_s20 = smov 0   ;;  %s2409_s21 = smov 0  }
   0xf   :  { %s2411_s22 = smov 0   ;;  %s2413_s23 = smov 0  }
  0x10   :  { %s2415_s24 = smov 0   ;;  %s2417_s25 = smov 0  }
  0x11 LB: > { %2762 = sst [smem:[#allocation8_spill]] %s2277_s18  ;;  %s1904_s26 = sadd.s32 4294967295, %s2305_s25   ;;  %s2305_s25 = sphi %s2417_s25, %s28_s25   ;;  %s2301_s24 = sphi %s2415_s24, %s2807_s24   ;;  %s2297_s23 = sphi %s2413_s23, %s2806_s23   ;;  %s2293_s22 = sphi %s2411_s22, %s2805_s22   ;;  %s2289_s21 = sphi %s2409_s21, %s2804_s21   ;;  %s2285_s20 = sphi %s2407_s20, %s2803_s20   ;;  %s2281_s19 = sphi %s2405_s19, %s2802_s19   ;;  %s2277_s18 = sphi %s2403_s18, %s2801_s18  }
  0x12   : > { %2763 = sst [smem:[#allocation9_spill]] %s2281_s19  ;;  %s1905_s27 = sadd.s32 4294967294, %s2305_s25  }
  0x13   : > { %2764 = sst [smem:[#allocation10_spill]] %s2285_s20  ;;  %s37_s28 = sadd.s32 1, %s2297_s23 }
  0x14   : > { %2765 = sst [smem:[#allocation11_spill]] %s2289_s21  ;;  %p38_p0 = scmp.ge.s32.totalorder %s37_s28, 4 }
  0x15   : > { %2766 = sst [smem:[#allocation12_spill]] %s2293_s22  ;;  %s40_s29 = sadd.s32 1, %s2301_s24 }
  0x16   : > { %2767 = sst [smem:[#allocation13_spill]] %s2297_s23  ;;  %p443_p1 = scmp.ne.s32.totalorder %s2285_s20, %s2281_s19 }
  0x17   : > { %2768 = sst [smem:[#allocation14_spill]] %s2301_s24  ;;  %p444_p2 = scmp.eq.s32.totalorder %s1904_s26, 7 }
  0x18   : > { %2769 = sst [smem:[#allocation15_spill]] %s2305_s25  ;;  %s2809_s28 = smov (%p38_p0, %s37_s28), 0 }
  0x19   : > { %2770 = sst [smem:[#allocation16_spill]] %s2809_s28  ;;  %s2811_s29 = smov (!%p38_p0, %s40_s29), %s2301_s24 }
  0x1a   : > { %p2452_p3 = por %p444_p2, %p443_p1  ;;  %p449_p4 = scmp.ne.s32.totalorder %s2281_s19, %s2277_s18 }
  0x1b   : > { %p42_p5 = scmp.ge.s32.totalorder %s2811_s29, 2  ;;  %p450_p6 = scmp.eq.s32.totalorder %s1905_s27, 7 }
  0x1c   : > { %s2771_s30 = scalar_select %p2452_p3, 1, 0 }
  0x1d   : > { %p1908_p7 = scmp.ge.s32.totalorder %s2305_s25, 1  ;;  %p590_p8 = scmp.lt.s32.totalorder %s2305_s25, 9 }
  0x1e   : > { %2772 = sst [smem:[#allocation17_spill]] %s2771_s30  ;;  %s2813_s29 = smov (%p42_p5, %s2811_s29), 0 }
  0x1f   : > { %2773 = sst [smem:[#allocation18_spill]] %s2813_s29  ;;  %p2462_p9 = por %p450_p6, %p449_p4 }
  0x20   : > { %p591_p10 = pnand %p1908_p7, %p590_p8  ;;  %s430_s17 = ssub.s32 %s2301_s24, %s2813_s29 }
  0x21   : > { %s2774_s16 = scalar_select %p2462_p9, 1, 0 }
  0x22   : > { %s433_s26 = sadd.s32 1, %s2285_s20  ;;  %p431_p11 = scmp.eq.s32.totalorder %s430_s17, 0 }
  0x23   : > { %2775 = sst [smem:[#allocation19_spill]] %s2774_s16  ;;  %594 = sbr.rel (%p591_p10) target bundleno = 2496 (0x9c0), region = 80 }
  0x24   : > { %s2470_s28 = scalar_select %p431_p11, %s2285_s20, %s433_s26  }
  0x26   : > { %2776 = sst [smem:[#allocation20_spill]] %s2470_s28 }
  0x28   : > { %s2743_s27 = sand.u32 1, %s2281_s19   ;;  %p710_p12 = scmp.lt.s32.totalorder %s2293_s22, 1 }
  0x29   : > { %s2476_s23 = sshll.u32 %s2743_s27, 3  ;;  %p762_p13 = scmp.lt.s32.totalorder %s2289_s21, 3 }
  0x2a   : > { %s711_s16 = scalar_select %p710_p12, %s2293_s22, 1 }
  0x2b   : > { %s763_s18 = scalar_select %p762_p13, %s2289_s21, 3 }
  0x2c   : > { %s1966_s29 = sshll.u32 %s711_s16, 3  ;;  %s1969_s24 = sshll.u32 %s711_s16, 2 }
  0x2d   : > { %s2777_s0 = sld [smem:[#allocation23_spill]]  ;;  %s2522_s21 = scalar_lea.vmem %s2724_s8, %s1969_s24 }
  0x2e   : > { %s2779_s1 = sld [smem:[#allocation24_spill]] }
  0x2f   : > { %s2781_s2 = sld [smem:[#allocation25_spill]] }
  0x30   : > { %s2782_s3 = sld [smem:[#allocation26_spill]] }
  0x31   : > { %s2783_s4 = sld [smem:[#allocation27_spill]] }
  0x32   : > { %s2784_s5 = sld [smem:[#allocation28_spill]] }
  0x33   : > { %s2484_s28 = scalar_lea.vmem %s2777_s0, %s1966_s29  ;;  %s2785_s7 = sld [smem:[#allocation30_spill]] }
  0x34   : > { %2778 = sst [smem:[#allocation21_spill]] %s2484_s28  ;;  %s2489_s15 = scalar_lea.vmem %s2779_s1, %s1966_s29 }
  0x35   : > { %2780 = sst [smem:[#allocation22_spill]] %s2489_s15  ;;  %s2494_s27 = scalar_lea.vmem %s2781_s2, %s1966_s29 }
  0x36   : > { %s2499_s13 = scalar_lea.vmem %s2782_s3, %s1969_s24  ;;  %s1972_s1 = sshll.u32 %s711_s16, 4 }
  0x37   : > { %s2504_s26 = scalar_lea.vmem %s2783_s4, %s1969_s24  ;;  %s2786_s6 = sld [smem:[#allocation29_spill]] }
  0x38   : > { %s2509_s25 = scalar_lea.vmem %s2784_s5, %s1969_s24  ;;  %s2527_s0 = scalar_lea.vmem %s2725_s9, %s1972_s1 }
  0x39   : > { %s749_s2 = scalar_lea.vmem %s2785_s7, %s1969_s24  ;;  %s1930_s16 = sshll.u32 %s763_s18, 1 }
  0x3a   : > { %s766_s20 = sadd.s32 %s1966_s29, %s1930_s16  ;;  %s2787_s18 = sld [smem:[#allocation11_spill]] }
  0x3b   : > { %s1932_s5 = sshll.u32 %s766_s20, 2  ;;  %s1938_s14 = sshll.u32 %s766_s20, 3 }
  0x3c   : > { %s2532_s15 = scalar_lea.vmem %s2726_s10, %s1932_s5  ;;  %s2537_s3 = scalar_lea.vmem %s2727_s11, %s1932_s5 }
  0x3d   : > { %s2517_s22 = scalar_lea.vmem %s2786_s6, %s1972_s1  ;;  %s2542_s4 = scalar_lea.vmem %s2728_s12, %s1938_s14 }
  0x3e   : > { %s709_s1 = scalar_lea.vmem [#allocation5], %s2476_s23 }
  0x40   : > { %p1939_p0 = scmp.ne.s32.totalorder %s2787_s18, 0 }
  0x41   : > { %s2309_s5 = smov (!%p1939_p0), 16   ;;  %s2310_s6 = smov (!%p1939_p0), 126  }
  0x42   : > { %791 = sbr.rel (%p1939_p0) target bundleno = 1419 (0x58b), region = 84  ;;  %s2311_s7 = smov (!%p1939_p0), 127  }
  0x43   : > { %s2313_s29 = smov (!%p1939_p0), 32  }
  0x47   : > { %v794_v0 = vld [vmem:[%s749_s2] sm:$0x3]  ;;  %vm798_vm0 = vcmask 130048   ;;  %v795_v1 = vld [vmem:[%s749_s2 + $0x2] sm:$0x3]  ;;  %v2307_v2 = vmov 0.0  }
  0x48   : > { %2007 = vmatprep.subr.bf16.mxu0 %v2307_v2  ;;  %2013 = vmatprep.subr.bf16.mxu1 %v2307_v2  ;;  %v803_v3 = vsel %vm798_vm0, %v794_v0, 0  ;;  %1282 = vst.msk [vmem:[#allocation4] sm:$0xff] %vm798_vm0, %v2307_v2  ;;  %1283 = vst.msk [vmem:[#allocation4 + $0x8] sm:$0xff] %vm798_vm0, %v2307_v2  ;;  %v849_v4 = vsel %vm798_vm0, %v795_v1, 0  ;;  %vm2308_vm1 = vmmov 0   ;;  %v796_v7 = vld [vmem:[%s2527_s0] sm:$0xff] }
  0x49   : > { %2008 = vmatpush3.bf16.xpose.msra.mxu0 %v803_v3  ;;  %2014 = vmatpush3.bf16.xpose.msra.mxu1 %v849_v4  ;;  %v792_v5 = vld [vmem:[%s2494_s27] sm:$0xf]  ;;  %v793_v6 = vld [vmem:[%s2494_s27 + $0x4] sm:$0xf]  ;;  %v797_v8 = vld [vmem:[%s2527_s0 + $0x8] sm:$0xff]  ;;  %vm891_vm2 = vcmask 31744  }
  0x4a   : > { %2009 = vmatprep.mubr.msk.bf16.mxu0 %vm2308_vm1, %v2307_v2  ;;  %2015 = vmatprep.mubr.msk.bf16.mxu1 %vm2308_vm1, %v2307_v2  ;;  %v916_v31 = vld [vmem:[%s2522_s21] sm:$0x3]  ;;  %vm921_vm3 = vcmask 1041408   ;;  %v917_v32 = vld [vmem:[%s2522_s21 + $0x2] sm:$0x3]  ;;  %s2788_s2 = sld [smem:[#allocation21_spill]] }
  0x4b   : > { %2019 = vmatprep.subr.bf16.mxu0 %v2307_v2  ;;  %2025 = vmatprep.subr.bf16.mxu1 %v2307_v2  ;;  %v923_v33 = vsel %vm921_vm3, %v916_v31, 0  ;;  %v969_v34 = vsel %vm921_vm3, %v917_v32, 0  ;;  %v1011_v37 = vld [vmem:[%s2499_s13] sm:$0x3]  ;;  %v1012_v41 = vld [vmem:[%s2499_s13 + $0x2] sm:$0x3] }
  0x4c   : > { %v1013_v38 = vld [vmem:[%s2509_s25] sm:$0x3]  ;;  %v1014_v42 = vld [vmem:[%s2509_s25 + $0x2] sm:$0x3]  ;;  %v1020_v1 = vld [vmem:[%s2517_s22 + $0x8] sm:$0xff]  ;;  %vm1231_vm4 = vcmask 7168  }
  0x4d   : > { %v1015_v39 = vadd.bf16 %v1013_v38, %v1011_v37  ;;  %v1016_v46 = vadd.bf16 %v1014_v42, %v1012_v41  ;;  %v1019_v59 = vld [vmem:[%s2517_s22] sm:$0xff]  ;;  %s2312_s13 = smov 125   ;;  %s2314_s27 = smov 48   ;;  %vm1268_vm5 = vcmask 392448   ;;  %vm1274_vm6 = vcmask 261248  }
  0x4e   : > { %vm1280_vm7 = vcmask 523648  }
  0x4f   : > { %v1025_v45 = vsel %vm798_vm0, %v1015_v39, 0  ;;  %v1071_v50 = vsel %vm798_vm0, %v1016_v46, 0 }
  0x50   : > { %2010 = vmatmul.mubr.msk.bf16.vlgmr.msra.gmra.mxu0 %vm798_vm0, %v792_v5  ;;  %2016 = vmatmul.mubr.msk.bf16.vlgmr.msra.gmra.mxu1 %vm798_vm0, %v793_v6  ;;  %v1017_v51 = vld [vmem:[%s2788_s2] sm:$0xf]  ;;  %v1018_v52 = vld [vmem:[%s2788_s2 + $0x4] sm:$0xf] }
  0x51   : > { %2021 = vmatprep.mubr.msk.bf16.mxu0 %vm2308_vm1, %v2307_v2  ;;  %2027 = vmatprep.mubr.msk.bf16.mxu1 %vm2308_vm1, %v2307_v2 }
  0x52   : > { %2020 = vmatpush3.bf16.msra.mxu0 %v923_v33  ;;  %2026 = vmatpush3.bf16.msra.mxu1 %v969_v34 }
  0x53   : > { %2031 = vmatprep.subr.bf16.mxu0 %v2307_v2  ;;  %2037 = vmatprep.subr.bf16.mxu1 %v2307_v2 }
 0x110   : > { %v839_v9 = vpop.f32.mrf.mxu0  ;;  %v885_v10 = vpop.f32.mrf.mxu1 }
 0x111   : > { %v840_v11 = vadd.f32 %v839_v9, %v796_v7  ;;  %v886_v12 = vadd.f32 %v885_v10, %v797_v8 }
 0x112   : > { %v2011_v13 = vpop.f32.mrf.mxu0  ;;  %v2017_v14 = vpop.f32.mrf.mxu1 }
 0x113   : > { %v892_v15 = vsel %vm891_vm2, %v840_v11, -inf  ;;  %v895_v18 = vsel %vm891_vm2, %v886_v12, -inf }
 0x114   : > { %v888_v16 = vpop.f32.mrf.mxu1  ;;  %893 = vmax.xlane.f32.xlu0 %v892_v15  ;;  %v842_v17 = vpop.f32.mrf.mxu0 }
 0x116   : > { %v2012_v19 = vpop.f32.mrf.mxu0  ;;  %v2018_v20 = vpop.f32.mrf.mxu1 }
 0x118   : > { %896 = vmax.xlane.f32.xlu0 %v895_v18 }
 0x19d   : > { %v894_v21 = vpop.xlane.xlu0 %893 }
 0x19e   : > { %v898_v22 = vsub.f32 %v840_v11, %v894_v21  ;;  %v1137_v21 = vld [vmem:[%s2504_s26] sm:$0x3] }
 0x1a0   : > { %v900_v23 = vmul.f32 1.442695, %v898_v22  ;;  %v1138_v22 = vld [vmem:[%s2504_s26 + $0x2] sm:$0x3] }
 0x1a1   : > { %v897_v24 = vpop.xlane.xlu0 %896 }
 0x1a2   : > { %2181 = vpow2.f32 %v900_v23  ;;  %v899_v25 = vsub.f32 %v886_v12, %v897_v24  ;;  %v1143_v23 = vsel %vm921_vm3, %v1137_v21, 0  ;;  %v1189_v24 = vsel %vm921_vm3, %v1138_v22, 0 }
 0x1a4   : > { %v902_v26 = vmul.f32 1.442695, %v899_v25 }
 0x1a6   : > { %2183 = vpow2.f32 %v902_v26 }
 0x1af   : > { %v2182_v27 = vpop.eup %2181 }
 0x1b0   : > { %v904_v28 = vsel %vm891_vm2, %v2182_v27, 0.0 }
 0x1b1   : > { %905 = vadd.xlane.f32.xlu1 %v904_v28 }
 0x1b3   : > { %v2184_v29 = vpop.eup %2183 }
 0x1b4   : > { %v907_v30 = vsel %vm891_vm2, %v2184_v29, 0.0 }
 0x1b5   : > { %908 = vadd.xlane.f32.xlu1 %v907_v30 }
 0x23a   : > { %v906_v35 = vpop.xlane.xlu1 %905 }
 0x23b   : > { %2185 = vrcp.f32 %v906_v35 }
 0x23e   : > { %v909_v36 = vpop.xlane.xlu1 %908 }
 0x23f   : > { %2187 = vrcp.f32 %v909_v36 }
 0x248   : > { %v2186_v40 = vpop.eup %2185 }
 0x249   : > { %v912_v43 = vmul.f32 %v2186_v40, %v2182_v27 }
 0x24b   : > { %v914_v44 = vpack.c.bf16 %v912_v43, %v912_v43 }
 0x24c   : > { %v2188_v47 = vpop.eup %2187 }
 0x24d   : > { %2022 = vmatmul.mubr.msk.bf16.vlgmr.msra.gmra.mxu0 %vm891_vm2, %v914_v44  ;;  %v913_v48 = vmul.f32 %v2188_v47, %v2184_v29 }
 0x24e   : > { %2032 = vmatpush3.bf16.xpose.msra.mxu0 %v1025_v45  ;;  %2033 = vmatprep.mubr.msk.bf16.mxu0 %vm2308_vm1, %v2307_v2 }
 0x24f   : > { %v915_v49 = vpack.c.bf16 %v913_v48, %v913_v48  ;;  %2043 = vmatprep.subr.bf16.mxu0 %v2307_v2 }
 0x251   : > { %2028 = vmatmul.mubr.msk.bf16.vlgmr.msra.gmra.mxu1 %vm891_vm2, %v915_v49 }
 0x252   : > { %2038 = vmatpush3.bf16.xpose.msra.mxu1 %v1071_v50  ;;  %2039 = vmatprep.mubr.msk.bf16.mxu1 %vm2308_vm1, %v2307_v2 }
 0x253   : > { %2049 = vmatprep.subr.bf16.mxu1 %v2307_v2 }
 0x255   : > { %2034 = vmatmul.mubr.msk.bf16.vlgmr.msra.gmra.mxu0 %vm798_vm0, %v1017_v51 }
 0x256   : > { %2045 = vmatprep.mubr.msk.bf16.mxu0 %vm2308_vm1, %v2307_v2  ;;  %2044 = vmatpush3.bf16.msra.mxu0 %v1143_v23 }
 0x259   : > { %2040 = vmatmul.mubr.msk.bf16.vlgmr.msra.gmra.mxu1 %vm798_vm0, %v1018_v52 }
 0x25a   : > { %2051 = vmatprep.mubr.msk.bf16.mxu1 %vm2308_vm1, %v2307_v2  ;;  %2050 = vmatpush3.bf16.msra.mxu1 %v1189_v24 }
 0x30d   : > { %v959_v53 = vpop.f32.mrf.mxu0 }
 0x30e   : > { %1263 = vst.msk [vmem:[#allocation3] sm:$0xff] %vm798_vm0, %v959_v53 }
 0x30f   : > { %v2023_v54 = vpop.f32.mrf.mxu0 }
 0x311   : > { %v962_v55 = vpop.f32.mrf.mxu0  ;;  %v1005_v56 = vpop.f32.mrf.mxu1 }
 0x313   : > { %v2024_v57 = vpop.f32.mrf.mxu0  ;;  %v2029_v58 = vpop.f32.mrf.mxu1 }
 0x315   : > { %v1008_v60 = vpop.f32.mrf.mxu1  ;;  %v1061_v61 = vpop.f32.mrf.mxu0 }
 0x316   : > { %v1062_v62 = vadd.f32 %v1061_v61, %v1019_v59 }
 0x317   : > { %v2030_v63 = vpop.f32.mrf.mxu1  ;;  %v2035_v0 = vpop.f32.mrf.mxu0 }
 0x318   : > { %v1113_v3 = vsel %vm891_vm2, %v1062_v62, -inf }
 0x319   : > { %v1107_v4 = vpop.f32.mrf.mxu1  ;;  %1114 = vmax.xlane.f32.xlu0 %v1113_v3  ;;  %v1064_v2 = vpop.f32.mrf.mxu0 }
 0x31a   : > { %v1108_v5 = vadd.f32 %v1107_v4, %v1020_v1 }
 0x31b   : > { %v2036_v6 = vpop.f32.mrf.mxu0  ;;  %v2041_v7 = vpop.f32.mrf.mxu1 }
 0x31c   : > { %v1116_v8 = vsel %vm891_vm2, %v1108_v5, -inf }
 0x31d   : > { %1117 = vmax.xlane.f32.xlu1 %v1116_v8  ;;  %v1110_v9 = vpop.f32.mrf.mxu1 }
 0x31f   : > { %v2042_v10 = vpop.f32.mrf.mxu1 }
 0x3a2   : > { %v1115_v11 = vpop.xlane.xlu0 %1114 }
 0x3a3   : > { %v1119_v12 = vsub.f32 %v1062_v62, %v1115_v11 }
 0x3a5   : > { %v1121_v13 = vmul.f32 1.442695, %v1119_v12 }
 0x3a6   : > { %v1118_v14 = vpop.xlane.xlu1 %1117 }
 0x3a7   : > { %2189 = vpow2.f32 %v1121_v13  ;;  %v1120_v15 = vsub.f32 %v1108_v5, %v1118_v14 }
 0x3a9   : > { %v1123_v16 = vmul.f32 1.442695, %v1120_v15 }
 0x3ab   : > { %2191 = vpow2.f32 %v1123_v16 }
 0x3b4   : > { %v2190_v17 = vpop.eup %2189 }
 0x3b5   : > { %v1125_v18 = vsel %vm891_vm2, %v2190_v17, 0.0 }
 0x3b6   : > { %1126 = vadd.xlane.f32.xlu0 %v1125_v18 }
 0x3b8   : > { %v2192_v19 = vpop.eup %2191 }
 0x3b9   : > { %v1128_v20 = vsel %vm891_vm2, %v2192_v19, 0.0 }
 0x3ba   : > { %1129 = vadd.xlane.f32.xlu1 %v1128_v20 }
 0x3cb   : > { %1271 = vrot.lane.b32.xlu1 %v1005_v56, %s2309_s5 }
 0x43f   : > { %v1127_v25 = vpop.xlane.xlu0 %1126 }
 0x440   : > { %2193 = vrcp.f32 %v1127_v25 }
 0x443   : > { %v1130_v26 = vpop.xlane.xlu1 %1129 }
 0x444   : > { %2195 = vrcp.f32 %v1130_v26 }
 0x447   : > { %v1272_v33 = vpop.permute.xlu1 %1271 }
 0x44d   : > { %v2194_v27 = vpop.eup %2193 }
 0x44e   : > { %v1132_v28 = vmul.f32 %v2194_v27, %v2190_v17 }
 0x450   : > { %1245 = vrot.lane.b32.xlu0 %v1132_v28, %s2310_s6  ;;  %1236 = vrot.lane.b32.xlu1 %v1132_v28, %s2311_s7  ;;  %v1135_v29 = vpack.c.bf16 %v1132_v28, %v1132_v28  ;;  %1232 = vst.msk [vmem:[#allocation2] sm:$0xff] %vm1231_vm4, %v1132_v28 }
 0x451   : > { %v2196_v30 = vpop.eup %2195 }
 0x452   : > { %2046 = vmatmul.mubr.msk.bf16.vlgmr.msra.gmra.mxu0 %vm891_vm2, %v1135_v29  ;;  %v1134_v31 = vmul.f32 %v2196_v30, %v2192_v19 }
 0x454   : > { %1254 = vrot.lane.b32.xlu0 %v1132_v28, %s2312_s13  ;;  %1238 = vrot.lane.b32.xlu1 %v1134_v31, %s2311_s7  ;;  %v1136_v32 = vpack.c.bf16 %v1134_v31, %v1134_v31  ;;  %1233 = vst.msk [vmem:[#allocation2 + $0x8] sm:$0xff] %vm1231_vm4, %v1134_v31 }
 0x456   : > { %2052 = vmatmul.mubr.msk.bf16.vlgmr.msra.gmra.mxu1 %vm891_vm2, %v1136_v32 }
 0x458   : > { %1247 = vrot.lane.b32.xlu1 %v1134_v31, %s2310_s6 }
 0x45c   : > { %1256 = vrot.lane.b32.xlu1 %v1134_v31, %s2312_s13 }
 0x4c2   : > { %v1246_v34 = vpop.permute.xlu0 %1245  ;;  %v1237_v35 = vpop.permute.xlu1 %1236 }
 0x4c3   : > { %1252 = vst.msk [vmem:[#allocation2 + $0x20] sm:$0xff] %vm1231_vm4, %v1246_v34  ;;  %1243 = vst.msk [vmem:[#allocation2 + $0x10] sm:$0xff] %vm1231_vm4, %v1237_v35 }
 0x4c6   : > { %v1255_v36 = vpop.permute.xlu0 %1254  ;;  %v1239_v37 = vpop.permute.xlu1 %1238 }
 0x4c7   : > { %1261 = vst.msk [vmem:[#allocation2 + $0x30] sm:$0xff] %vm1231_vm4, %v1255_v36  ;;  %1244 = vst.msk [vmem:[#allocation2 + $0x18] sm:$0xff] %vm1231_vm4, %v1239_v37 }
 0x4ca   : > { %v1248_v38 = vpop.permute.xlu1 %1247 }
 0x4cb   : > { %1253 = vst.msk [vmem:[#allocation2 + $0x28] sm:$0xff] %vm1231_vm4, %v1248_v38 }
 0x4ce   : > { %v1257_v39 = vpop.permute.xlu1 %1256 }
 0x4cf   : > { %1262 = vst.msk [vmem:[#allocation2 + $0x38] sm:$0xff] %vm1231_vm4, %v1257_v39 }
 0x512   : > { %v1179_v40 = vpop.f32.mrf.mxu0 }
 0x513   : > { %1265 = vrot.lane.b32.xlu0 %v1179_v40, %s2313_s29 }
 0x514   : > { %v2047_v41 = vpop.f32.mrf.mxu0 }
 0x516   : > { %v1182_v42 = vpop.f32.mrf.mxu0  ;;  %v1225_v43 = vpop.f32.mrf.mxu1 }
 0x517   : > { %1277 = vrot.lane.b32.xlu0 %v1225_v43, %s2314_s27 }
 0x518   : > { %v2048_v44 = vpop.f32.mrf.mxu0  ;;  %v2053_v45 = vpop.f32.mrf.mxu1 }
 0x51a   : > { %v1228_v46 = vpop.f32.mrf.mxu1 }
 0x51c   : > { %v2054_v47 = vpop.f32.mrf.mxu1 }
 0x585   : > { %v1266_v48 = vpop.permute.xlu0 %1265 }
 0x586   : > { %1269 = vst.msk [vmem:[#allocation3] sm:$0xff] %vm1268_vm5, %v1266_v48 }
 0x587   : > { %1275 = vst.msk [vmem:[#allocation3] sm:$0xff] %vm1274_vm6, %v1272_v33 }
 0x589   : > { %v1278_v49 = vpop.permute.xlu0 %1277 }
 0x58a   : > { %1281 = vst.msk [vmem:[#allocation3] sm:$0xff] %vm1280_vm7, %v1278_v49 }
 0x58b PF: > { %s2789_s26 = sld [smem:[#allocation22_spill]]  ;;  %v1286_v50 = vld [vmem:[%s2532_s15] sm:$0xf]  ;;  %vm1290_vm8 = vcmask 130048   ;;  %v1287_v51 = vld [vmem:[%s2532_s15 + $0x4] sm:$0xf] }
 0x58c   : > { %v2315_v52 = vmov 0.0   ;;  %v1295_v53 = vsel %vm1290_vm8, %v1286_v50, 0  ;;  %v1341_v54 = vsel %vm1290_vm8, %v1287_v51, 0  ;;  %vm2316_vm9 = vmmov 0   ;;  %v1288_v57 = vld [vmem:[%s2542_s4] sm:$0xff]  ;;  %v1289_v58 = vld [vmem:[%s2542_s4 + $0x8] sm:$0xff] }
 0x58d   : > { %2055 = vmatprep.subr.bf16.mxu0 %v2315_v52  ;;  %2061 = vmatprep.subr.bf16.mxu1 %v2315_v52  ;;  %vm1383_vm10 = vcmask 64512   ;;  %s2790_s25 = sld [smem:[#allocation11_spill]]  ;;  %v1408_v17 = vld [vmem:[%s2537_s3] sm:$0xf]  ;;  %vm1413_vm11 = vcmask 1043456   ;;  %v2317_v21 = vmov 0  }
 0x58e   : > { %2056 = vmatpush3.bf16.xpose.msra.mxu0 %v1295_v53  ;;  %2062 = vmatpush3.bf16.xpose.msra.mxu1 %v1341_v54  ;;  %v1409_v18 = vld [vmem:[%s2537_s3 + $0x4] sm:$0xf]  ;;  %v1415_v19 = vsel %vm1413_vm11, %v1408_v17, 0  ;;  %v1503_v34 = vld [vmem:[#allocation4] sm:$0xff]  ;;  %v1504_v40 = vld [vmem:[#allocation4 + $0x8] sm:$0xff] }
 0x58f   : > { %2057 = vmatprep.mubr.msk.bf16.mxu0 %vm2316_vm9, %v2315_v52  ;;  %2063 = vmatprep.mubr.msk.bf16.mxu1 %vm2316_vm9, %v2315_v52  ;;  %v1461_v20 = vsel %vm1413_vm11, %v1409_v18, 0 }
 0x590   : > { %2067 = vmatprep.subr.bf16.mxu0 %v2315_v52  ;;  %2073 = vmatprep.subr.bf16.mxu1 %v2315_v52 }
 0x591   : > { %v1284_v55 = vld [vmem:[%s2789_s26] sm:$0xf]  ;;  %v1285_v56 = vld [vmem:[%s2789_s26 + $0x4] sm:$0xf]  ;;  %2197 = vset.pattern.permute.xlu0 %v2317_v21  ;;  %2198 = vset.pattern.permute.xlu1 %v2317_v21 }
 0x593   : > { %s1952_s22 = sshll.u32 %s2790_s25, 4  ;;  %p1953_p1 = scmp.ne.s32.totalorder %s2790_s25, 3 }
 0x594   : > { %s1506_s21 = scalar_lea.vmem [#allocation2], %s1952_s22  ;;  %s2791_s16 = sld [smem:[#allocation31_spill]] (!%p1953_p1) }
 0x595   : > { %2058 = vmatmul.mubr.msk.bf16.vlgmr.msra.gmra.mxu0 %vm1290_vm8, %v1284_v55  ;;  %2064 = vmatmul.mubr.msk.bf16.vlgmr.msra.gmra.mxu1 %vm1290_vm8, %v1285_v56  ;;  %v1507_v22 = vld [vmem:[%s1506_s21] sm:$0xff]  ;;  %v1508_v23 = vld [vmem:[%s1506_s21 + $0x8] sm:$0xff]  ;;  %s2318_s20 = smov (!%p1953_p1), 64   ;;  %s2320_s15 = smov (!%p1953_p1), 80  }
 0x596   : > { %2069 = vmatprep.mubr.msk.bf16.mxu0 %vm2316_vm9, %v2315_v52  ;;  %2075 = vmatprep.mubr.msk.bf16.mxu1 %vm2316_vm9, %v2315_v52  ;;  %s2792_s13 = sld [smem:[#allocation32_spill]] (!%p1953_p1) }
 0x597   : > { %2068 = vmatpush3.bf16.msra.mxu0 %v1415_v19  ;;  %2074 = vmatpush3.bf16.msra.mxu1 %v1461_v20 }
 0x655   : > { %v1331_v59 = vpop.f32.mrf.mxu0  ;;  %v1377_v60 = vpop.f32.mrf.mxu1 }
 0x656   : > { %v1332_v61 = vadd.f32 %v1331_v59, %v1288_v57  ;;  %v1378_v62 = vadd.f32 %v1377_v60, %v1289_v58 }
 0x657   : > { %v2059_v63 = vpop.f32.mrf.mxu0  ;;  %v2065_v0 = vpop.f32.mrf.mxu1 }
 0x658   : > { %v1384_v1 = vsel %vm1383_vm10, %v1332_v61, -inf  ;;  %v1387_v2 = vsel %vm1383_vm10, %v1378_v62, -inf }
 0x659   : > { %v1380_v3 = vpop.f32.mrf.mxu1  ;;  %1385 = vmax.xlane.f32.xlu0 %v1384_v1  ;;  %v1334_v4 = vpop.f32.mrf.mxu0 }
 0x65b   : > { %v2060_v5 = vpop.f32.mrf.mxu0  ;;  %v2066_v6 = vpop.f32.mrf.mxu1 }
 0x65d   : > { %1388 = vmax.xlane.f32.xlu0 %v1387_v2 }
 0x673   : > { %1511 = vperm.xlu0 %2197, %v1507_v22  }
 0x6e2   : > { %v1386_v7 = vpop.xlane.xlu0 %1385 }
 0x6e3   : > { %v1390_v8 = vsub.f32 %v1332_v61, %v1386_v7 }
 0x6e5   : > { %v1392_v9 = vmul.f32 1.442695, %v1390_v8 }
 0x6e6   : > { %v1389_v10 = vpop.xlane.xlu0 %1388 }
 0x6e7   : > { %2199 = vpow2.f32 %v1392_v9  ;;  %v1391_v11 = vsub.f32 %v1378_v62, %v1389_v10 }
 0x6e9   : > { %v1394_v12 = vmul.f32 1.442695, %v1391_v11 }
 0x6eb   : > { %2201 = vpow2.f32 %v1394_v12 }
 0x6ee   : > { %v1512_v32 = vpop.permute.xlu0 %1511 }
 0x6f4   : > { %v2200_v13 = vpop.eup %2199 }
 0x6f5   : > { %v1396_v14 = vsel %vm1383_vm10, %v2200_v13, 0.0 }
 0x6f6   : > { %1397 = vadd.xlane.f32.xlu1 %v1396_v14 }
 0x6f8   : > { %v2202_v15 = vpop.eup %2201 }
 0x6f9   : > { %v1399_v16 = vsel %vm1383_vm10, %v2202_v15, 0.0 }
 0x6fa   : > { %1400 = vadd.xlane.f32.xlu1 %v1399_v16 }
 0x70b   : > { %1516 = vperm.xlu1 %2198, %v1508_v23  }
 0x77f   : > { %v1398_v24 = vpop.xlane.xlu1 %1397 }
 0x780   : > { %2203 = vrcp.f32 %v1398_v24 }
 0x783   : > { %v1401_v25 = vpop.xlane.xlu1 %1400 }
 0x784   : > { %2205 = vrcp.f32 %v1401_v25 }
 0x787   : > { %v1517_v37 = vpop.permute.xlu1 %1516 }
 0x78d   : > { %v2204_v26 = vpop.eup %2203 }
 0x78e   : > { %v1404_v27 = vmul.f32 %v2204_v26, %v2200_v13 }
 0x790   : > { %v1406_v28 = vpack.c.bf16 %v1404_v27, %v1404_v27 }
 0x791   : > { %v2206_v29 = vpop.eup %2205 }
 0x792   : > { %2070 = vmatmul.mubr.msk.bf16.vlgmr.msra.gmra.mxu0 %vm1383_vm10, %v1406_v28  ;;  %v1405_v30 = vmul.f32 %v2206_v29, %v2202_v15 }
 0x794   : > { %v1407_v31 = vpack.c.bf16 %v1405_v30, %v1405_v30 }
 0x796   : > { %2076 = vmatmul.mubr.msk.bf16.vlgmr.msra.gmra.mxu1 %vm1383_vm10, %v1407_v31 }
 0x852   : > { %v1451_v33 = vpop.f32.mrf.mxu0 }
 0x853   : > { %v1519_v35 = vmul.f32 %v1512_v32, %v1451_v33 }
 0x854   : > { %v2071_v36 = vpop.f32.mrf.mxu0 }
 0x855   : > { %v1521_v38 = vadd.f32 %v1519_v35, %v1503_v34 }
 0x856   : > { %v1497_v39 = vpop.f32.mrf.mxu1  ;;  %v1454_v41 = vpop.f32.mrf.mxu0 }
 0x857   : > { %1523 = vst.msk [vmem:[#allocation4] sm:$0xff] %vm1290_vm8, %v1521_v38  ;;  %v1520_v42 = vmul.f32 %v1517_v37, %v1497_v39 }
 0x858   : > { %v2072_v43 = vpop.f32.mrf.mxu0  ;;  %v2077_v44 = vpop.f32.mrf.mxu1  ;;  %1528 = sbr.rel (%p1953_p1) target bundleno = 2471 (0x9a7), region = 88 }
 0x859   : > { %v1522_v45 = vadd.f32 %v1520_v42, %v1504_v40 }
 0x85a   : > { %v1500_v46 = vpop.f32.mrf.mxu1 }
 0x85b   : > { %1524 = vst.msk [vmem:[#allocation4 + $0x8] sm:$0xff] %vm1290_vm8, %v1522_v45 }
 0x85c   : > { %v2078_v47 = vpop.f32.mrf.mxu1 }
 0x85d   : > { %v2207_v50 = vld [vmem:[%s2791_s16 + $0x28] sm:$0xff]   ;;  %v2319_v51 = vmov 0.0   ;;  %v2208_v52 = vld [vmem:[%s2791_s16 + $0x20] sm:$0xff]   ;;  %vm2321_vm12 = vmmov 0   ;;  %v2209_v53 = vld [vmem:[%s2791_s16 + $0x18] sm:$0xff]   ;;  %vm1534_vm13 = vcmask 654848  }
 0x85e   : > { %v1529_v48 = vld [vmem:[#allocation4] sm:$0xff]  ;;  %2079 = vmatprep.subr.bf16.mxu0 %v2319_v51  ;;  %2091 = vmatprep.mubr.msk.bf16.mxu0 %vm2321_vm12, %v2319_v51  ;;  %v2210_v54 = vld [vmem:[%s2791_s16 + $0x10] sm:$0xff]   ;;  %v2212_v56 = vld [vmem:[%s2791_s16] sm:$0xff]   ;;  %vm1542_vm14 = vcmask 786048   ;;  %vm1601_vm15 = vcmask 785408   ;;  %vm1645_vm0 = vcmask 261120  }
 0x85f   : > { %1531 = vrot.lane.b32.xlu0 %v1529_v48, %s2318_s20  ;;  %2080 = vmatpush3.bf16.msra.mxu0 %v2207_v50  ;;  %v2211_v55 = vld [vmem:[%s2791_s16 + $0x8] sm:$0xff]   ;;  %v1954_v61 = vld [vmem:[%s2792_s13] ss:$0 sm:$0xff] }
 0x860   : > { %2081 = vmatprep.subr.bf16.mxu0 %v2319_v51 }
 0x862   : > { %v1537_v49 = vld [vmem:[#allocation4 + $0x8] sm:$0xff] }
 0x863   : > { %1539 = vrot.lane.b32.xlu0 %v1537_v49, %s2320_s15  ;;  %2082 = vmatpush3.bf16.msra.mxu0 %v2208_v52 }
 0x864   : > { %2083 = vmatprep.subr.bf16.mxu0 %v2319_v51 }
 0x867   : > { %2084 = vmatpush3.bf16.msra.mxu0 %v2209_v53 }
 0x868   : > { %2085 = vmatprep.subr.bf16.mxu0 %v2319_v51 }
 0x86b   : > { %2086 = vmatpush3.bf16.msra.mxu0 %v2210_v54 }
 0x86c   : > { %2087 = vmatprep.subr.bf16.mxu0 %v2319_v51 }
 0x86f   : > { %2088 = vmatpush3.bf16.msra.mxu0 %v2211_v55 }
 0x870   : > { %2089 = vmatprep.subr.bf16.mxu0 %v2319_v51 }
 0x873   : > { %2090 = vmatpush3.bf16.msra.mxu0 %v2212_v56 }
 0x8d1   : > { %v1532_v57 = vpop.permute.xlu0 %1531 }
 0x8d2   : > { %1535 = vst.msk [vmem:[#allocation3] sm:$0xff] %vm1534_vm13, %v1532_v57 }
 0x8d5   : > { %v1540_v58 = vpop.permute.xlu0 %1539 }
 0x8d6   : > { %1543 = vst.msk [vmem:[#allocation3] sm:$0xff] %vm1542_vm14, %v1540_v58 }
 0x8dd   : > { %v1544_v59 = vld [vmem:[#allocation3] sm:$0xff] }
 0x8de   : > { %v1545_v60 = vpack.c.bf16 %v1544_v59, %v1544_v59 }
 0x8e0   : > { %2092 = vmatmul.mubr.msk.bf16.vlgmr.msra.gmra.mxu0 %vm1601_vm15, %v1545_v60 }
 0x9a0   : > { %v1639_v62 = vpop.f32.mrf.mxu0 }
 0x9a1   : > { %v1640_v63 = vadd.f32 %v1954_v61, %v1639_v62 }
 0x9a2   : > { %v2093_v0 = vpop.f32.mrf.mxu0 }
 0x9a3   : > { %1646 = vst.msk [vmem:[%s709_s1] sm:$0xff] %vm1645_vm0, %v1640_v63 }
 0x9a4   : > { %v1642_v1 = vpop.f32.mrf.mxu0 }
 0x9a6   : > { %v2094_v3 = vpop.f32.mrf.mxu0 }
 0x9a7 PF: > { %s2793_s29 = sld [smem:[#allocation12_spill]]  ;;  %s1661_s20 = sshll.u32 %s709_s1, 4  ;;  %s1662_s20 = int_to_ptr.vmem [resolvable:$true] %s1661_s20 }
 0x9a8   : > { %s2794_s27 = sld [smem:[#allocation9_spill]]  ;;  %s2213_s15 = scalar_lea.vmem %s1662_s20, 128 }
 0x9a9   : > { %s2796_s17 = sld [smem:[#allocation33_spill]]  ;;  %p2214_p2 = scmp.ne.s32.totalorder %s1662_s20, %s2213_s15 }
 0x9aa   : > { %s2322_s19 = smov [#allocation5]  }
 0x9ab   : > { %p2215_p4 = pnand %p2214_p2, %p2452_p3  ;;  %s2217_s3 = sshll.u32 %s2322_s19, 4  ;;  %s2218_s3 = int_to_ptr.vmem [resolvable:$false] %s2217_s3 }
 0x9ac   : > { %s2219_s24 = scalar_lea.vmem %s2218_s3, 256  ;;  %p2220_p6 = scmp.lt.s32.totalorder %s1662_s20, %s2218_s3 }
 0x9ad   : > { %s1963_s25 = sshll.u32 %s2793_s29, 7  ;;  %p2216_p5 = pneg %p2215_p4 }
 0x9ae   : > { %s2797_s14 = sand.u32 1, %s2794_s27   ;;  %p2221_p7 = scmp.lt.s32.totalorder %s2219_s24, %s2213_s15 }
 0x9af   : > { %s1659_s0 = scalar_lea.hbm %s2796_s17, %s1963_s25  ;;  %s1648_s30 = scalar_lea.sflag [#allocation6], %s2797_s14 }
 0x9b0   : > { %p2222_p8 = por %p2221_p7, %p2220_p6 }
 0x9b2   : > { %p2223_p10 = pnand %p2222_p8, %p2216_p5 }
 0x9b4   : > { %2226 = shalt.err (!%p2223_p10)
}
 0x9b5   : > { %s2227_s28 = scalar_lea.hbm %s1659_s0, 128  ;;  %s2231_s4 = scalar_lea.hbm %s2796_s17, 256 }
 0x9b6   : > { %p2228_p11 = scmp.ne.s32.totalorder %s1659_s0, %s2227_s28  ;;  %p2232_p0 = scmp.lt.s32.totalorder %s1659_s0, %s2796_s17 }
 0x9b7   : > { %p2233_p1 = scmp.lt.s32.totalorder %s2231_s4, %s2227_s28 }
 0x9b8   : > { %p2229_p12 = pnand %p2228_p11, %p2452_p3 }
 0x9b9   : > { %p2234_p2 = por %p2233_p1, %p2232_p0 }
 0x9ba   : > { %p2230_p13 = pneg %p2229_p12 }
 0x9bc   : > { %p2235_p4 = pnand %p2234_p2, %p2230_p13 }
 0x9be   : > { %2238 = shalt.err (!%p2235_p4)
}
 0x9bf   : > { %2095 = dma.vmem_to_hbm [thread:$0]  (%p2452_p3), %s1662_s20, 128, %s1659_s0, %s1648_s30  }
 0x9c0 PF: > { %s2798_s5 = sld [smem:[#allocation15_spill]] }
 0x9c1   : > { %s2799_s6 = sld [smem:[#allocation8_spill]] }
 0x9c6   : > { %p2101_p5 = scmp.ge.s32.totalorder %s2798_s5, 2 }
 0x9c7   : > { %s1673_s13 = sand.u32 1, %s2799_s6  }
 0x9c8   : > { %p2098_p6 = pnand %p2101_p5, %p2462_p9  ;;  %s1674_s29 = scalar_lea.sflag [#allocation6], %s1673_s13 }
 0x9ca   : > { %p2099_p7 = pneg %p2098_p6 }
 0x9cc   : > { %2272 = dma.done.wait (%p2099_p7), %s1674_s29, 128  }
 0x9cd   : > { %2274 = vsyncadd (%p2099_p7), %s1674_s29, 4294967168  ;;  %s28_s25 = sadd.s32 1, %s2798_s5   ;;  %s2801_s18 = sld [smem:[#allocation9_spill]] }
 0x9ce   : > { %p25_p8 = scmp.ge.s32.totalorder %s28_s25, 10   ;;  %s2802_s19 = sld [smem:[#allocation10_spill]] }
 0x9cf   : > { %s2803_s20 = sld [smem:[#allocation20_spill]] }
 0x9d0   : > { %s2804_s21 = sld [smem:[#allocation13_spill]]  ;;  %27 = sbr.rel (!%p25_p8) target bundleno = 17 (0x11), region = 164 }
 0x9d1   : > { %s2805_s22 = sld [smem:[#allocation14_spill]] }
 0x9d2   : > { %s2806_s23 = sld [smem:[#allocation16_spill]] }
 0x9d3   : > { %s2807_s24 = sld [smem:[#allocation18_spill]] }
 0x9d5   :  { %1679 = vsyncpa [#allocation6], 1 }
 0x9d6   :  { %1681 = vsyncpa [#allocation6 + $0x1], 1 }

</bundles_post_ra>
